<compile_context>
chip_gen: v6e
topology: v6e:2x2x1
jax: 0.10.0
libtpu: 0.0.40
codegen_flags: <defaults>
</compile_context>

<pallas_src>
import functools

import jax
import jax.numpy as jnp
from jax.experimental import pallas as pl
from jax.experimental.pallas import tpu as pltpu


# ----------------------------- Pallas kernel ------------------------------ #
def _fused_detect_kernel(x_ref, w1_ref, b1_ref, w2_ref, b2_ref, o_ref, col_ref,
                         *, tm, c, taps):
    """One spatial row-tile of one image per grid step.

    x_ref  : (Lf, C)      f32  zero-padded NHWC image, spatial flattened row-major
                               (whole image; constant index_map -> DMA'd once/image)
    w1_ref : (9*C, HID)   bf16 conv weight, rows ordered (ki, kj, c)
    b1_ref : (1, HID)     f32  conv bias
    w2_ref : (na*no, HID) bf16 Detect 1x1 weight, all anchors packed
    b2_ref : (na*no, 1)   f32  Detect bias
    o_ref  : (na*no, TM)  f32  sigmoid(Detect); spatial dim in lanes (lane-dense)
    col_ref: (TM, 9*C)    bf16 im2col tile (VMEM scratch)
    """
    base = pl.multiple_of(pl.program_id(1) * tm, tm)

    # In-kernel im2col: 9 shifted row-slices packed along lanes -> one K=9*C dot.
    for t, off in enumerate(taps):                                  # static unroll
        col_ref[:, t * c:(t + 1) * c] = (
            x_ref[pl.ds(base + off, tm), :].astype(jnp.bfloat16))

    acc = jnp.dot(col_ref[...], w1_ref[...], preferred_element_type=jnp.float32)
    acc = acc + b1_ref[...]                                         # bias, f32
    feat = (acc * jax.nn.sigmoid(acc)).astype(jnp.bfloat16)         # SiLU -> bf16

    # Detect head: all anchors in one matmul; contract the HID dim of BOTH
    # operands (A @ B^T form) so the result is already (na*no, TM) -- the store
    # is lane-dense and no explicit transpose is needed.
    logits = jax.lax.dot_general(
        w2_ref[...], feat, (((1,), (1,)), ((), ())),
        preferred_element_type=jnp.float32) + b2_ref[...]
    o_ref[...] = jax.nn.sigmoid(logits)


# ------------------------------- JAX glue --------------------------------- #
@functools.partial(jax.jit, static_argnames=("na", "no"))
def _fused_forward(im_nchw, w1p, b1p, w2p, b2p, *, na, no):
    """NCHW image -> (B, na*H*W, no) Detect output via one fused pallas_call."""
    B, C, H, W = im_nchw.shape
    P = W + 2                              # padded width
    HP = H * P                             # output base rows (incl. 2 pad cols/row)
    no_all = na * no
    hid = w1p.shape[-1]

    tm = 128 if HP <= 4096 else 512        # row tile, multiple of 128 (lane-dense)
    T = (HP + tm - 1) // tm
    hp_pad = T * tm
    lf = hp_pad + 2 * P + 2                # keeps the last tap slice in-bounds

    # Minimal layout glue: NHWC + halo zero-pad + flatten (no im2col in HBM).
    x = jnp.transpose(im_nchw, (0, 2, 3, 1)).astype(jnp.float32)    # NHWC
    xp = jnp.pad(x, ((0, 0), (1, 1), (1, 1), (0, 0)))               # (B, H+2, P, C)
    xf = jnp.pad(xp.reshape(B, (H + 2) * P, C),
                 ((0, 0), (0, lf - (H + 2) * P), (0, 0)))           # (B, lf, C)

    taps = tuple(ki * P + kj for ki in range(3) for kj in range(3))
    kernel = functools.partial(_fused_detect_kernel, tm=tm, c=C, taps=taps)

    # Advisory cost on UNPADDED dims.
    flops = 2 * B * H * W * (9 * C * hid + hid * no_all)
    transcendentals = B * H * W * (hid + no_all)
    bytes_accessed = (B * H * W * C * 4 + w1p.size * 2 + w2p.size * 2
                      + b1p.size * 4 + b2p.size * 4 + B * no_all * H * W * 4)

    out = pl.pallas_call(
        kernel,
        out_shape=jax.ShapeDtypeStruct((B, no_all, hp_pad), jnp.float32),
        grid_spec=pltpu.PrefetchScalarGridSpec(
            num_scalar_prefetch=0,
            grid=(B, T),
            in_specs=[
                # whole padded image; constant over the tile axis -> VMEM-resident
                pl.BlockSpec((None, lf, C), lambda b, t: (b, 0, 0)),
                pl.BlockSpec((9 * C, hid), lambda b, t: (0, 0)),     # conv w
                pl.BlockSpec((1, hid), lambda b, t: (0, 0)),          # conv b
                pl.BlockSpec((no_all, hid), lambda b, t: (0, 0)),     # head w
                pl.BlockSpec((no_all, 1), lambda b, t: (0, 0)),       # head b
            ],
            out_specs=pl.BlockSpec((None, no_all, tm), lambda b, t: (b, 0, t)),
            scratch_shapes=[pltpu.VMEM((tm, 9 * C), jnp.bfloat16)],
        ),
        compiler_params=pltpu.CompilerParams(
            dimension_semantics=("parallel", "parallel"),
            vmem_limit_bytes=32 * 1024 * 1024),
        cost_estimate=pl.CostEstimate(flops=flops,
                                      transcendentals=transcendentals,
                                      bytes_accessed=bytes_accessed),
    )(xf, w1p, b1p, w2p, b2p)

    # Strip padded rows / the 2 padded columns; reorder to YOLOv5 Detect layout.
    y = out[:, :, :HP].reshape(B, na, no, H, P)[:, :, :, :, :W]
    y = jnp.transpose(y, (0, 1, 3, 4, 2))
    # TODO(synk): anchor/grid box decode ((xy*2-0.5+grid)*stride, (wh*2)^2*anchor)
    # omitted -- a synthetic init has no meaningful anchors/strides.
    return y.reshape(B, na * H * W, no)


class DetectMultiBackendPallas:
    """`pt`-backend DetectMultiBackend semantics with a synthetic wrapped model."""

    def __init__(self, key, ch=4, hidden=16, na=3, nc=3, fp16=False):
        self.fp16 = fp16              # fp16 &= pt -> default False
        self.nhwc = False             # pt backend keeps NCHW at the wrapper level
        self.pt = True
        self.stride = 32
        self.names = {i: f"class{i}" for i in range(nc)}
        self.na, self.nc, self.no = na, nc, 5 + nc

        k1, k2, k3, k4 = jax.random.split(key, 4)
        self.w1 = 0.1 * jax.random.normal(k1, (hidden, ch, 3, 3), jnp.float32)
        self.b1 = 0.1 * jax.random.normal(k2, (hidden,), jnp.float32)
        self.w2 = 0.1 * jax.random.normal(k3, (na * self.no, hidden, 1, 1), jnp.float32)
        self.b2 = 0.1 * jax.random.normal(k4, (na * self.no,), jnp.float32)

        # Pre-packed kernel operands (no lane padding needed; bf16 MXU weights).
        self.w1p = (jnp.transpose(self.w1, (2, 3, 1, 0))        # (ki,kj,c,o)
                    .reshape(9 * ch, hidden).astype(jnp.bfloat16))
        self.b1p = self.b1.reshape(1, hidden).astype(jnp.float32)
        self.w2p = self.w2.reshape(na * self.no, hidden).astype(jnp.bfloat16)
        self.b2p = self.b2.reshape(na * self.no, 1).astype(jnp.float32)

    def forward(self, im):
        b, ch, h, w = im.shape
        if self.fp16 and im.dtype != jnp.bfloat16:
            # TODO(synk): TPUs have no IEEE fp16 path; emulate im.half() by rounding
            # through bf16 (kernel runs bf16 MXU with f32 accumulation regardless).
            im = im.astype(jnp.bfloat16)
        if self.nhwc:                       # always False for the pt backend
            im = jnp.transpose(im, (0, 2, 3, 1))
        return _fused_forward(im, self.w1p, self.b1p, self.w2p, self.b2p,
                              na=self.na, no=self.no)

    __call__ = forward


# -------------------------- pure-JAX reference ----------------------------- #
def _reference(model, im):
    y = jax.lax.conv_general_dilated(
        im, model.w1, (1, 1), ((1, 1), (1, 1)),
        dimension_numbers=("NCHW", "OIHW", "NCHW"))
    y = y + model.b1[None, :, None, None]
    y = y * jax.nn.sigmoid(y)
    y = jax.lax.conv_general_dilated(
        y, model.w2, (1, 1), ((0, 0), (0, 0)),
        dimension_numbers=("NCHW", "OIHW", "NCHW"))
    y = jax.nn.sigmoid(y + model.b2[None, :, None, None])
    b, _, h, w = im.shape
    y = y.reshape(b, model.na, model.no, h, w)
    y = jnp.transpose(y, (0, 1, 3, 4, 2)).reshape(b, model.na * h * w, model.no)
    return y


if __name__ == "__main__":
    key = jax.random.PRNGKey(0)
    kx, kp = jax.random.split(key)
    x = jax.random.normal(kx, (2, 4, 16, 16), jnp.float32)   # NCHW, like PyTorch

    model = DetectMultiBackendPallas(kp, ch=4, hidden=16, na=3, nc=3, fp16=False)
    out = jax.block_until_ready(model(x))
    assert out.shape == (2, 3 * 16 * 16, 8), out.shape

    ref = jax.block_until_ready(_reference(model, x))
    err = float(jnp.max(jnp.abs(out - ref)))
    assert jnp.allclose(out, ref, atol=3e-2, rtol=3e-2), err

    print("KERNEL_OK")
</pallas_src>

<mosaic_0001>
module attributes {stable_mosaic.version = 11 : i64} {
  func.func @_fused_detect_kernel(%arg0: i32, %arg1: i32, %arg2: memref<1x422x4xf32, #tpu.memory_space<vmem>>, %arg3: memref<36x16xbf16, #tpu.memory_space<vmem>>, %arg4: memref<1x16xf32, #tpu.memory_space<vmem>>, %arg5: memref<24x16xbf16, #tpu.memory_space<vmem>>, %arg6: memref<24x1xf32, #tpu.memory_space<vmem>>, %arg7: memref<1x24x128xf32, #tpu.memory_space<vmem>>, %arg8: memref<128x36xbf16, #tpu.memory_space<vmem>>) attributes {dimension_semantics = [#tpu.dimension_semantics<parallel>, #tpu.dimension_semantics<parallel>], iteration_bounds = array<i64: 2, 3>, scalar_prefetch = 0 : i64, scratch_operands = 1 : i64, tpu.core_type = #tpu.core_type<tc>, window_params = [{transform_indices = @transform_0, window_bounds = array<i64: 1, 422, 4>}, {pipeline_mode = #tpu.pipeline_mode<synchronous>, transform_indices = @transform_1, window_bounds = array<i64: 36, 16>}, {pipeline_mode = #tpu.pipeline_mode<synchronous>, transform_indices = @transform_2, window_bounds = array<i64: 1, 16>}, {pipeline_mode = #tpu.pipeline_mode<synchronous>, transform_indices = @transform_3, window_bounds = array<i64: 24, 16>}, {pipeline_mode = #tpu.pipeline_mode<synchronous>, transform_indices = @transform_4, window_bounds = array<i64: 24, 1>}, {transform_indices = @transform_5, window_bounds = array<i64: 1, 24, 128>}]} {
    %c128_i32 = arith.constant 128 : i32
    %0 = arith.muli %arg1, %c128_i32 : i32
    %1 = tpu.assume_multiple %0, 128 : i32
    %c0_i32 = arith.constant 0 : i32
    %2 = arith.addi %1, %c0_i32 : i32
    %c0 = arith.constant 0 : index
    %3 = arith.index_cast %2 : i32 to index
    %c0_0 = arith.constant 0 : index
    %4 = vector.load %arg2[%c0, %3, %c0_0] : memref<1x422x4xf32, #tpu.memory_space<vmem>>, vector<1x128x4xf32>
    %5 = vector.shape_cast %4 : vector<1x128x4xf32> to vector<128x4xf32>
    %6 = arith.truncf %5 : vector<128x4xf32> to vector<128x4xbf16>
    %c0_1 = arith.constant 0 : index
    %c0_2 = arith.constant 0 : index
    %7 = vector.load %arg8[%c0_1, %c0_2] : memref<128x36xbf16, #tpu.memory_space<vmem>>, vector<128x4xbf16>
    tpu.vector_store %arg8[%c0_1, %c0_2], %6 {strides = array<i32>} : memref<128x36xbf16, #tpu.memory_space<vmem>>, vector<128x4xbf16>,
    %c1_i32 = arith.constant 1 : i32
    %8 = arith.addi %1, %c1_i32 : i32
    %c0_3 = arith.constant 0 : index
    %9 = arith.index_cast %8 : i32 to index
    %c0_4 = arith.constant 0 : index
    %10 = vector.load %arg2[%c0_3, %9, %c0_4] : memref<1x422x4xf32, #tpu.memory_space<vmem>>, vector<1x128x4xf32>
    %11 = vector.shape_cast %10 : vector<1x128x4xf32> to vector<128x4xf32>
    %12 = arith.truncf %11 : vector<128x4xf32> to vector<128x4xbf16>
    %c0_5 = arith.constant 0 : index
    %c4 = arith.constant 4 : index
    %13 = vector.load %arg8[%c0_5, %c4] : memref<128x36xbf16, #tpu.memory_space<vmem>>, vector<128x4xbf16>
    tpu.vector_store %arg8[%c0_5, %c4], %12 {strides = array<i32>} : memref<128x36xbf16, #tpu.memory_space<vmem>>, vector<128x4xbf16>,
    %c2_i32 = arith.constant 2 : i32
    %14 = arith.addi %1, %c2_i32 : i32
    %c0_6 = arith.constant 0 : index
    %15 = arith.index_cast %14 : i32 to index
    %c0_7 = arith.constant 0 : index
    %16 = vector.load %arg2[%c0_6, %15, %c0_7] : memref<1x422x4xf32, #tpu.memory_space<vmem>>, vector<1x128x4xf32>
    %17 = vector.shape_cast %16 : vector<1x128x4xf32> to vector<128x4xf32>
    %18 = arith.truncf %17 : vector<128x4xf32> to vector<128x4xbf16>
    %c0_8 = arith.constant 0 : index
    %c8 = arith.constant 8 : index
    %19 = vector.load %arg8[%c0_8, %c8] : memref<128x36xbf16, #tpu.memory_space<vmem>>, vector<128x4xbf16>
    tpu.vector_store %arg8[%c0_8, %c8], %18 {strides = array<i32>} : memref<128x36xbf16, #tpu.memory_space<vmem>>, vector<128x4xbf16>,
    %c18_i32 = arith.constant 18 : i32
    %20 = arith.addi %1, %c18_i32 : i32
    %c0_9 = arith.constant 0 : index
    %21 = arith.index_cast %20 : i32 to index
    %c0_10 = arith.constant 0 : index
    %22 = vector.load %arg2[%c0_9, %21, %c0_10] : memref<1x422x4xf32, #tpu.memory_space<vmem>>, vector<1x128x4xf32>
    %23 = vector.shape_cast %22 : vector<1x128x4xf32> to vector<128x4xf32>
    %24 = arith.truncf %23 : vector<128x4xf32> to vector<128x4xbf16>
    %c0_11 = arith.constant 0 : index
    %c12 = arith.constant 12 : index
    %25 = vector.load %arg8[%c0_11, %c12] : memref<128x36xbf16, #tpu.memory_space<vmem>>, vector<128x4xbf16>
    tpu.vector_store %arg8[%c0_11, %c12], %24 {strides = array<i32>} : memref<128x36xbf16, #tpu.memory_space<vmem>>, vector<128x4xbf16>,
    %c19_i32 = arith.constant 19 : i32
    %26 = arith.addi %1, %c19_i32 : i32
    %c0_12 = arith.constant 0 : index
    %27 = arith.index_cast %26 : i32 to index
    %c0_13 = arith.constant 0 : index
    %28 = vector.load %arg2[%c0_12, %27, %c0_13] : memref<1x422x4xf32, #tpu.memory_space<vmem>>, vector<1x128x4xf32>
    %29 = vector.shape_cast %28 : vector<1x128x4xf32> to vector<128x4xf32>
    %30 = arith.truncf %29 : vector<128x4xf32> to vector<128x4xbf16>
    %c0_14 = arith.constant 0 : index
    %c16 = arith.constant 16 : index
    %31 = vector.load %arg8[%c0_14, %c16] : memref<128x36xbf16, #tpu.memory_space<vmem>>, vector<128x4xbf16>
    tpu.vector_store %arg8[%c0_14, %c16], %30 {strides = array<i32>} : memref<128x36xbf16, #tpu.memory_space<vmem>>, vector<128x4xbf16>,
    %c20_i32 = arith.constant 20 : i32
    %32 = arith.addi %1, %c20_i32 : i32
    %c0_15 = arith.constant 0 : index
    %33 = arith.index_cast %32 : i32 to index
    %c0_16 = arith.constant 0 : index
    %34 = vector.load %arg2[%c0_15, %33, %c0_16] : memref<1x422x4xf32, #tpu.memory_space<vmem>>, vector<1x128x4xf32>
    %35 = vector.shape_cast %34 : vector<1x128x4xf32> to vector<128x4xf32>
    %36 = arith.truncf %35 : vector<128x4xf32> to vector<128x4xbf16>
    %c0_17 = arith.constant 0 : index
    %c20 = arith.constant 20 : index
    %37 = vector.load %arg8[%c0_17, %c20] : memref<128x36xbf16, #tpu.memory_space<vmem>>, vector<128x4xbf16>
    tpu.vector_store %arg8[%c0_17, %c20], %36 {strides = array<i32>} : memref<128x36xbf16, #tpu.memory_space<vmem>>, vector<128x4xbf16>,
    %c36_i32 = arith.constant 36 : i32
    %38 = arith.addi %1, %c36_i32 : i32
    %c0_18 = arith.constant 0 : index
    %39 = arith.index_cast %38 : i32 to index
    %c0_19 = arith.constant 0 : index
    %40 = vector.load %arg2[%c0_18, %39, %c0_19] : memref<1x422x4xf32, #tpu.memory_space<vmem>>, vector<1x128x4xf32>
    %41 = vector.shape_cast %40 : vector<1x128x4xf32> to vector<128x4xf32>
    %42 = arith.truncf %41 : vector<128x4xf32> to vector<128x4xbf16>
    %c0_20 = arith.constant 0 : index
    %c24 = arith.constant 24 : index
    %43 = vector.load %arg8[%c0_20, %c24] : memref<128x36xbf16, #tpu.memory_space<vmem>>, vector<128x4xbf16>
    tpu.vector_store %arg8[%c0_20, %c24], %42 {strides = array<i32>} : memref<128x36xbf16, #tpu.memory_space<vmem>>, vector<128x4xbf16>,
    %c37_i32 = arith.constant 37 : i32
    %44 = arith.addi %1, %c37_i32 : i32
    %c0_21 = arith.constant 0 : index
    %45 = arith.index_cast %44 : i32 to index
    %c0_22 = arith.constant 0 : index
    %46 = vector.load %arg2[%c0_21, %45, %c0_22] : memref<1x422x4xf32, #tpu.memory_space<vmem>>, vector<1x128x4xf32>
    %47 = vector.shape_cast %46 : vector<1x128x4xf32> to vector<128x4xf32>
    %48 = arith.truncf %47 : vector<128x4xf32> to vector<128x4xbf16>
    %c0_23 = arith.constant 0 : index
    %c28 = arith.constant 28 : index
    %49 = vector.load %arg8[%c0_23, %c28] : memref<128x36xbf16, #tpu.memory_space<vmem>>, vector<128x4xbf16>
    tpu.vector_store %arg8[%c0_23, %c28], %48 {strides = array<i32>} : memref<128x36xbf16, #tpu.memory_space<vmem>>, vector<128x4xbf16>,
    %c38_i32 = arith.constant 38 : i32
    %50 = arith.addi %1, %c38_i32 : i32
    %c0_24 = arith.constant 0 : index
    %51 = arith.index_cast %50 : i32 to index
    %c0_25 = arith.constant 0 : index
    %52 = vector.load %arg2[%c0_24, %51, %c0_25] : memref<1x422x4xf32, #tpu.memory_space<vmem>>, vector<1x128x4xf32>
    %53 = vector.shape_cast %52 : vector<1x128x4xf32> to vector<128x4xf32>
    %54 = arith.truncf %53 : vector<128x4xf32> to vector<128x4xbf16>
    %c0_26 = arith.constant 0 : index
    %c32 = arith.constant 32 : index
    %55 = vector.load %arg8[%c0_26, %c32] : memref<128x36xbf16, #tpu.memory_space<vmem>>, vector<128x4xbf16>
    tpu.vector_store %arg8[%c0_26, %c32], %54 {strides = array<i32>} : memref<128x36xbf16, #tpu.memory_space<vmem>>, vector<128x4xbf16>,
    %c0_27 = arith.constant 0 : index
    %c0_28 = arith.constant 0 : index
    %56 = vector.load %arg8[%c0_27, %c0_28] : memref<128x36xbf16, #tpu.memory_space<vmem>>, vector<128x36xbf16>
    %c0_29 = arith.constant 0 : index
    %c0_30 = arith.constant 0 : index
    %57 = vector.load %arg3[%c0_29, %c0_30] : memref<36x16xbf16, #tpu.memory_space<vmem>>, vector<36x16xbf16>
    %cst = arith.constant dense<0.000000e+00> : vector<128x16xf32>
    %58 = tpu.matmul %56, %57, %cst {dimension_numbers = #tpu.dot_dimension_numbers<[1], [0], [0], [1], [0, 0, 1, 1], [], []>} : vector<128x36xbf16>, vector<36x16xbf16>, vector<128x16xf32> -> vector<128x16xf32>
    %c0_31 = arith.constant 0 : index
    %c0_32 = arith.constant 0 : index
    %59 = vector.load %arg4[%c0_31, %c0_32] : memref<1x16xf32, #tpu.memory_space<vmem>>, vector<1x16xf32>
    %60 = vector.broadcast %59 : vector<1x16xf32> to vector<128x16xf32>
    %61 = arith.addf %58, %60 : vector<128x16xf32>
    %62 = arith.negf %61 : vector<128x16xf32>
    %63 = math.exp %62 : vector<128x16xf32>
    %cst_33 = arith.constant 1.000000e+00 : f32
    %64 = vector.broadcast %cst_33 : f32 to vector<128x16xf32>
    %65 = arith.addf %64, %63 : vector<128x16xf32>
    %66 = arith.divf %64, %65 : vector<128x16xf32>
    %67 = arith.mulf %61, %66 : vector<128x16xf32>
    %68 = arith.truncf %67 : vector<128x16xf32> to vector<128x16xbf16>
    %c0_34 = arith.constant 0 : index
    %c0_35 = arith.constant 0 : index
    %69 = vector.load %arg5[%c0_34, %c0_35] : memref<24x16xbf16, #tpu.memory_space<vmem>>, vector<24x16xbf16>
    %cst_36 = arith.constant dense<0.000000e+00> : vector<24x128xf32>
    %70 = tpu.matmul %69, %68, %cst_36 {dimension_numbers = #tpu.dot_dimension_numbers<[1], [1], [0], [0], [0, 0, 1, 0], [], []>} : vector<24x16xbf16>, vector<128x16xbf16>, vector<24x128xf32> -> vector<24x128xf32>
    %c0_37 = arith.constant 0 : index
    %c0_38 = arith.constant 0 : index
    %71 = vector.load %arg6[%c0_37, %c0_38] : memref<24x1xf32, #tpu.memory_space<vmem>>, vector<24x1xf32>
    %72 = vector.broadcast %71 : vector<24x1xf32> to vector<24x128xf32>
    %73 = arith.addf %70, %72 : vector<24x128xf32>
    %74 = arith.negf %73 : vector<24x128xf32>
    %75 = math.exp %74 : vector<24x128xf32>
    %cst_39 = arith.constant 1.000000e+00 : f32
    %76 = vector.broadcast %cst_39 : f32 to vector<24x128xf32>
    %77 = arith.addf %76, %75 : vector<24x128xf32>
    %78 = arith.divf %76, %77 : vector<24x128xf32>
    %c0_40 = arith.constant 0 : index
    %c0_41 = arith.constant 0 : index
    %c0_42 = arith.constant 0 : index
    %79 = vector.load %arg7[%c0_40, %c0_41, %c0_42] : memref<1x24x128xf32, #tpu.memory_space<vmem>>, vector<1x24x128xf32>
    %80 = vector.shape_cast %79 : vector<1x24x128xf32> to vector<24x128xf32>
    %81 = vector.shape_cast %78 : vector<24x128xf32> to vector<1x24x128xf32>
    tpu.vector_store %arg7[%c0_40, %c0_41, %c0_42], %81 {strides = array<i32>} : memref<1x24x128xf32, #tpu.memory_space<vmem>>, vector<1x24x128xf32>,
    return
  }
  func.func @transform_0(%arg0: i32, %arg1: i32) -> (i32, i32, i32) {
    %c0_i32 = arith.constant 0 : i32
    %c0_i32_0 = arith.constant 0 : i32
    %c0_i32_1 = arith.constant 0 : i32
    return %arg0, %c0_i32, %c0_i32_0 : i32, i32, i32
  }
  func.func @transform_1(%arg0: i32, %arg1: i32) -> (i32, i32) {
    %c0_i32 = arith.constant 0 : i32
    %c0_i32_0 = arith.constant 0 : i32
    %c0_i32_1 = arith.constant 0 : i32
    return %c0_i32, %c0_i32_0 : i32, i32
  }
  func.func @transform_2(%arg0: i32, %arg1: i32) -> (i32, i32) {
    %c0_i32 = arith.constant 0 : i32
    %c0_i32_0 = arith.constant 0 : i32
    %c0_i32_1 = arith.constant 0 : i32
    return %c0_i32, %c0_i32_0 : i32, i32
  }
  func.func @transform_3(%arg0: i32, %arg1: i32) -> (i32, i32) {
    %c0_i32 = arith.constant 0 : i32
    %c0_i32_0 = arith.constant 0 : i32
    %c0_i32_1 = arith.constant 0 : i32
    return %c0_i32, %c0_i32_0 : i32, i32
  }
  func.func @transform_4(%arg0: i32, %arg1: i32) -> (i32, i32) {
    %c0_i32 = arith.constant 0 : i32
    %c0_i32_0 = arith.constant 0 : i32
    %c0_i32_1 = arith.constant 0 : i32
    return %c0_i32, %c0_i32_0 : i32, i32
  }
  func.func @transform_5(%arg0: i32, %arg1: i32) -> (i32, i32, i32) {
    %c0_i32 = arith.constant 0 : i32
    %c0_i32_0 = arith.constant 0 : i32
    return %arg0, %c0_i32, %arg1 : i32, i32, i32
  }
}

</mosaic_0001>

<bundles_post_ra>
// kernel: _fused_forward.1
= control target key start
LH: loop header
LB: loop body
LE: loop exit
PB: predicated region body
PF: predicated region fallthrough
CT: control target
= control target key end

     0   :  { %s2784_s18 = smov 0   ;;  %s2786_s19 = smov 0   ;;  %s3438_s0 = inlined_call_operand.vmem [shape: f32[2,422,4], index: 0, kind: input, shape index: {}]   ;;  %s3439_s1 = inlined_call_operand.vmem [shape: bf16[36,16], index: 1, kind: input, shape index: {}]   ;;  %s3440_s2 = inlined_call_operand.vmem [shape: f32[1,16], index: 2, kind: input, shape index: {}]   ;;  %s3441_s3 = inlined_call_operand.vmem [shape: bf16[24,16], index: 3, kind: input, shape index: {}]   ;;  %s3442_s4 = inlined_call_operand.vmem [shape: f32[24,1], index: 4, kind: input, shape index: {}]   ;;  %s3443_s5 = inlined_call_operand.vmem [shape: f32[2,24,384], index: 5, kind: output, shape index: {}]  }
   0x1   :  { %s2788_s20 = smov 0   ;;  %s2790_s21 = smov 0  }
   0x2   :  { %s2792_s22 = smov 0   ;;  %s2794_s23 = smov 0  }
   0x3   :  { %s2796_s24 = smov 0  }
   0x4 LB: > { %s24_s25 = sadd.s32 1, %s2735_s22  ;;  %s27_s26 = sadd.s32 1, %s2739_s23  ;;  %s2743_s24 = sphi %s2796_s24, %s15_s24   ;;  %s2739_s23 = sphi %s2794_s23, %s3450_s23   ;;  %s2735_s22 = sphi %s2792_s22, %s3449_s22   ;;  %s2731_s21 = sphi %s2790_s21, %s3448_s21   ;;  %s2727_s20 = sphi %s2788_s20, %s3447_s20   ;;  %s2723_s19 = sphi %s2786_s19, %s3446_s19   ;;  %s2719_s18 = sphi %s2784_s18, %s3445_s18  }
   0x5   : > { %p25_p0 = scmp.ge.s32.totalorder %s24_s25, 3  ;;  %s1981_s27 = sadd.s32 4294967295, %s2743_s24  }
   0x6   : > { %p156_p1 = scmp.ne.s32.totalorder %s2723_s19, %s2719_s18  ;;  %p157_p2 = scmp.eq.s32.totalorder %s1981_s27, 5 }
   0x7   : > { %s3452_s25 = smov (%p25_p0, %s24_s25), 0  ;;  %s3454_s26 = smov (!%p25_p0, %s27_s26), %s2739_s23 }
   0x8   : > { %s142_s28 = ssub.s32 %s2735_s22, %s3452_s25  ;;  %p29_p3 = scmp.ge.s32.totalorder %s3454_s26, 2 }
   0x9   : > { %p1985_p4 = scmp.ge.s32.totalorder %s2743_s24, 1  ;;  %p2830_p5 = por %p157_p2, %p156_p1 }
   0xa   : > { %p201_p6 = scmp.lt.s32.totalorder %s2743_s24, 7  ;;  %s3456_s26 = smov (%p29_p3, %s3454_s26), 0 }
   0xb   : > { %s141_s30 = ssub.s32 %s2739_s23, %s3456_s26  ;;  %s146_s7 = sadd.s32 1, %s2723_s19 }
   0xc   : > { %p202_p7 = pnand %p1985_p4, %p201_p6  ;;  %s143_s6 = sor.u32 %s142_s28, %s141_s30 }
   0xd   : > { %p144_p8 = scmp.eq.s32.totalorder %s143_s6, 0  ;;  %p228_p9 = scmp.lt.s32.totalorder (!%p202_p7), %s2731_s21, 1 }
   0xe   : > { %205 = sbr.rel (%p202_p7) target bundleno = 944 (0x3b0), region = 40  ;;  %s1987_s11 = sshll.u32 (!%p202_p7), %s2727_s20, 7 }
   0xf   : > { %s2841_s8 = scalar_select %p144_p8, %s2723_s19, %s146_s7  }
  0x10   : > { %s2745_s16 = smov (!%p202_p7), 4   ;;  %s2746_s17 = smov (!%p202_p7), 8  }
  0x11   : > { %s2747_s27 = smov (!%p202_p7), 12   ;;  %s2748_s28 = smov (!%p202_p7), 16  }
  0x12   : > { %s2749_s30 = smov (!%p202_p7), 20   ;;  %s2750_s6 = smov (!%p202_p7), 24  }
  0x13   : > { %s229_s9 = scalar_select %p228_p9, %s2731_s21, 1  ;;  %vm316_vm0 = vcmask 27648   ;;  %v2600_v58 = vld [vmem:[%s3439_s1 + $0x10] ss:$0 sps:$4 sm:$0x33]   ;;  %vm1489_vm1 = vcmask 1041408  }
  0x14   : > { %v1491_v61 = vsel %vm1489_vm1, %v2600_v58, 0  ;;  %2521 = vmatprep.subr.msk.bf16.mxu0 %vm1489_vm1, %v2600_v58  ;;  %s2752_s7 = smov 32   ;;  %vm447_vm2 = vcmask 60448   ;;  %vm578_vm3 = vcmask 93248   ;;  %vm709_vm4 = vcmask 126048  }
  0x15   : > { %s2531_s10 = smul.u32 424, %s229_s9  ;;  %2480 = vmatpush3.bf16.msra.mxu0 %v1491_v61  ;;  %vm840_vm5 = vcmask 158848   ;;  %vm971_vm6 = vcmask 191648   ;;  %vm1102_vm7 = vcmask 224448   ;;  %vm1233_vm8 = vcmask 257248  }
  0x16   : > { %vm1364_vm9 = vcmask 290048   ;;  %vm1464_vm10 = vcmask 293888   ;;  %vm1739_vm11 = vcmask 130048  }
  0x17   : > { %s232_s14 = scalar_lea.vmem %s3438_s0, %s2531_s10  ;;  %s2751_s10 = smov 28  }
  0x18   : > { %s2849_s15 = scalar_lea.vmem %s232_s14, %s1987_s11  ;;  %s225_s14 = sand.u32 1, %s2719_s18  }
  0x19   : > { %v2007_v0 = vld [vmem:[%s2849_s15 + $0x11] sm:$0xff]  ;;  %v2005_v1 = vld [vmem:[%s2849_s15 + $0x1] sm:$0xff]  ;;  %v2008_v2 = vld [vmem:[%s2849_s15 + $0x19] sm:$0xff] }
  0x1a   : > { %v2332_v3 = vpack.c.bf16 %v2007_v0, %v2007_v0  ;;  %v2330_v4 = vpack.c.bf16 %v2005_v1, %v2005_v1  ;;  %v2006_v5 = vld [vmem:[%s2849_s15 + $0x9] sm:$0xff]  ;;  %v2333_v6 = vpack.c.bf16 %v2008_v2, %v2008_v2  ;;  %v2041_v12 = vld [vmem:[%s2849_s15 + $0x1a] sm:$0xff]  ;;  %v2040_v13 = vld [vmem:[%s2849_s15 + $0x12] sm:$0xff] }
  0x1b   : > { %v2331_v7 = vpack.c.bf16 %v2006_v5, %v2006_v5  ;;  %v2039_v8 = vld [vmem:[%s2849_s15 + $0xa] sm:$0xff]  ;;  %v2038_v9 = vld [vmem:[%s2849_s15 + $0x2] sm:$0xff]  ;;  %v2349_v14 = vpack.c.bf16 %v2041_v12, %v2041_v12  ;;  %v2348_v15 = vpack.c.bf16 %v2040_v13, %v2040_v13  ;;  %v239_v23 = vld [vmem:[%s2849_s15 + $0x18] sm:$0xff] }
  0x1c   : > { %403 = vrot.lane.b32.xlu1 %v2332_v3, %s2745_s16  ;;  %399 = vrot.lane.b32.xlu0 %v2330_v4, %s2745_s16  ;;  %v2347_v10 = vpack.c.bf16 %v2039_v8, %v2039_v8  ;;  %v2346_v11 = vpack.c.bf16 %v2038_v9, %v2038_v9  ;;  %v2074_v16 = vld [vmem:[%s2849_s15 + $0x2a] sm:$0xff]  ;;  %v2073_v17 = vld [vmem:[%s2849_s15 + $0x22] sm:$0xff]  ;;  %v2317_v26 = vpack.c.bf16 %v239_v23, %v239_v23 }
  0x1d   : > { %v238_v18 = vld [vmem:[%s2849_s15 + $0x10] sm:$0xff]  ;;  %v236_v20 = vld [vmem:[%s2849_s15] sm:$0xff]  ;;  %v2871_v21 = vpack.c.bf16 %v2074_v16, %v2074_v16  ;;  %v237_v24 = vld [vmem:[%s2849_s15 + $0x8] sm:$0xff]  ;;  %v2877_v25 = vpack.c.bf16 %v2073_v17, %v2073_v17 }
  0x1e   : > { %v2316_v19 = vpack.c.bf16 %v238_v18, %v238_v18  ;;  %v2314_v22 = vpack.c.bf16 %v236_v20, %v236_v20  ;;  %v2315_v27 = vpack.c.bf16 %v237_v24, %v237_v24  ;;  %v2105_v28 = vld [vmem:[%s2849_s15 + $0x1b] sm:$0xff]  ;;  %v2104_v29 = vld [vmem:[%s2849_s15 + $0x13] sm:$0xff]  ;;  %320 = vst.msk [vmem:[#allocation2 + $0xc] sm:$0xf] %vm316_vm0, %v2317_v26  ;;  %v2107_v32 = vld [vmem:[%s2849_s15 + $0x2b] sm:$0xff] }
  0x1f   : > { %v2379_v30 = vpack.c.bf16 %v2105_v28, %v2105_v28  ;;  %v2378_v31 = vpack.c.bf16 %v2104_v29, %v2104_v29  ;;  %v2106_v33 = vld [vmem:[%s2849_s15 + $0x23] sm:$0xff]  ;;  %v2381_v34 = vpack.c.bf16 %v2107_v32, %v2107_v32  ;;  %v2137_v37 = vld [vmem:[%s2849_s15 + $0x14] sm:$0xff]  ;;  %v2140_v40 = vld [vmem:[%s2849_s15 + $0x2c] sm:$0xff] }
  0x20   : > { %405 = vrot.lane.b32.xlu1 %v2333_v6, %s2745_s16  ;;  %401 = vrot.lane.b32.xlu0 %v2331_v7, %s2745_s16  ;;  %319 = vst.msk [vmem:[#allocation2 + $0x8] sm:$0xf] %vm316_vm0, %v2316_v19  ;;  %317 = vst.msk [vmem:[#allocation2] sm:$0xf] %vm316_vm0, %v2314_v22  ;;  %v2380_v35 = vpack.c.bf16 %v2106_v33, %v2106_v33  ;;  %v2138_v36 = vld [vmem:[%s2849_s15 + $0x1c] sm:$0xff]  ;;  %v2394_v39 = vpack.c.bf16 %v2137_v37, %v2137_v37  ;;  %v2139_v41 = vld [vmem:[%s2849_s15 + $0x24] sm:$0xff] }
  0x21   : > { %318 = vst.msk [vmem:[#allocation2 + $0x4] sm:$0xf] %vm316_vm0, %v2315_v27  ;;  %v2395_v38 = vpack.c.bf16 %v2138_v36, %v2138_v36  ;;  %v2397_v42 = vpack.c.bf16 %v2140_v40, %v2140_v40  ;;  %v2396_v43 = vpack.c.bf16 %v2139_v41, %v2139_v41  ;;  %v2173_v44 = vld [vmem:[%s2849_s15 + $0x3c] sm:$0xff]  ;;  %v2172_v45 = vld [vmem:[%s2849_s15 + $0x34] sm:$0xff]  ;;  %v2203_v49 = vld [vmem:[%s2849_s15 + $0x25] sm:$0xff] }
  0x22   : > { %v2907_v46 = vpack.c.bf16 %v2173_v44, %v2173_v44  ;;  %v2909_v47 = vpack.c.bf16 %v2172_v45, %v2172_v45  ;;  %v2204_v48 = vld [vmem:[%s2849_s15 + $0x2d] sm:$0xff]  ;;  %v240_v52 = vld [vmem:[%s2849_s15 + $0x20] sm:$0xff]  ;;  %v2426_v53 = vpack.c.bf16 %v2203_v49, %v2203_v49  ;;  %v2205_v57 = vld [vmem:[%s2849_s15 + $0x35] sm:$0xff] }
  0x23   : > { %v2427_v50 = vpack.c.bf16 %v2204_v48, %v2204_v48  ;;  %v241_v51 = vld [vmem:[%s2849_s15 + $0x28] sm:$0xff]  ;;  %v2318_v55 = vpack.c.bf16 %v240_v52, %v240_v52  ;;  %v2206_v56 = vld [vmem:[%s2849_s15 + $0x3d] sm:$0xff]  ;;  %v2428_v60 = vpack.c.bf16 %v2205_v57, %v2205_v57  ;;  %v242_v4 = vld [vmem:[%s2849_s15 + $0x30] sm:$0xff] }
  0x24   : > { %532 = vrot.lane.b32.xlu1 %v2347_v10, %s2746_s17  ;;  %530 = vrot.lane.b32.xlu0 %v2346_v11, %s2746_s17  ;;  %v2319_v54 = vpack.c.bf16 %v241_v51, %v241_v51  ;;  %v2429_v59 = vpack.c.bf16 %v2206_v56, %v2206_v56  ;;  %v2237_v62 = vld [vmem:[%s2849_s15 + $0x2e] sm:$0xff]  ;;  %v2236_v63 = vld [vmem:[%s2849_s15 + $0x26] sm:$0xff]  ;;  %v2320_v8 = vpack.c.bf16 %v242_v4, %v242_v4 }
  0x25   : > { %321 = vst.msk [vmem:[#allocation2 + $0x10] sm:$0xf] %vm316_vm0, %v2318_v55  ;;  %v2601_v0 = vld [vmem:[%s3439_s1 + $0x8] sm:$0xff]   ;;  %v2443_v1 = vpack.c.bf16 %v2237_v62, %v2237_v62  ;;  %v2442_v2 = vpack.c.bf16 %v2236_v63, %v2236_v63  ;;  %v243_v3 = vld [vmem:[%s2849_s15 + $0x38] sm:$0xff]  ;;  %v2603_v9 = vld [vmem:[%s3439_s1] sm:$0xff]  }
  0x26   : > { %322 = vst.msk [vmem:[#allocation2 + $0x14] sm:$0xf] %vm316_vm0, %v2319_v54  ;;  %v2010_v5 = vld [vmem:[%s2849_s15 + $0x29] sm:$0xff]  ;;  %v2009_v6 = vld [vmem:[%s2849_s15 + $0x21] sm:$0xff]  ;;  %2481 = vmatprep.subr.bf16.mxu0 %v2601_v0  ;;  %v2321_v7 = vpack.c.bf16 %v243_v3, %v243_v3  ;;  %323 = vst.msk [vmem:[#allocation2 + $0x18] sm:$0xf] %vm316_vm0, %v2320_v8 }
  0x27   : > { %2482 = vmatpush3.bf16.msra.mxu0 %v2601_v0  ;;  %v2335_v10 = vpack.c.bf16 %v2010_v5, %v2010_v5  ;;  %v2334_v11 = vpack.c.bf16 %v2009_v6, %v2009_v6  ;;  %v2239_v12 = vld [vmem:[%s2849_s15 + $0x3e] sm:$0xff]  ;;  %v2238_v13 = vld [vmem:[%s2849_s15 + $0x36] sm:$0xff]  ;;  %v2078_v26 = vld [vmem:[%s2849_s15 + $0x4a] sm:$0xff] }
  0x28   : > { %536 = vrot.lane.b32.xlu1 %v2349_v14, %s2746_s17  ;;  %534 = vrot.lane.b32.xlu0 %v2348_v15, %s2746_s17  ;;  %324 = vst.msk [vmem:[#allocation2 + $0x1c] sm:$0xf] %vm316_vm0, %v2321_v7  ;;  %v2012_v16 = vld [vmem:[%s2849_s15 + $0x39] sm:$0xff]  ;;  %v2011_v17 = vld [vmem:[%s2849_s15 + $0x31] sm:$0xff]  ;;  %v2968_v28 = vpack.c.bf16 %v2078_v26, %v2078_v26 }
  0x29   : > { %2483 = vmatprep.subr.bf16.mxu0 %v2603_v9  ;;  %v2337_v18 = vpack.c.bf16 %v2012_v16, %v2012_v16  ;;  %v2336_v19 = vpack.c.bf16 %v2011_v17, %v2011_v17  ;;  %v2045_v20 = vld [vmem:[%s2849_s15 + $0x3a] sm:$0xff]  ;;  %v2044_v22 = vld [vmem:[%s2849_s15 + $0x32] sm:$0xff]  ;;  %v2077_v27 = vld [vmem:[%s2849_s15 + $0x42] sm:$0xff] }
  0x2a   : > { %v2353_v23 = vpack.c.bf16 %v2045_v20, %v2045_v20  ;;  %v2352_v24 = vpack.c.bf16 %v2044_v22, %v2044_v22  ;;  %v2108_v29 = vld [vmem:[%s2849_s15 + $0x33] sm:$0xff]  ;;  %v2111_v32 = vld [vmem:[%s2849_s15 + $0x4b] sm:$0xff]  ;;  %v2110_v33 = vld [vmem:[%s2849_s15 + $0x43] sm:$0xff] }
  0x2b   : > { %2484 = vmatpush3.bf16.msra.mxu0 %v2603_v9  ;;  %v2144_v36 = vld [vmem:[%s2849_s15 + $0x4c] sm:$0xff]  ;;  %v2143_v37 = vld [vmem:[%s2849_s15 + $0x44] sm:$0xff]  ;;  %v2177_v40 = vld [vmem:[%s2849_s15 + $0x5c] sm:$0xff] }
  0x2c   : > { %663 = vrot.lane.b32.xlu1 %v2349_v14, %s2747_s27  ;;  %661 = vrot.lane.b32.xlu0 %v2348_v15, %s2747_s27  ;;  %v2445_v14 = vpack.c.bf16 %v2239_v12, %v2239_v12  ;;  %v2444_v15 = vpack.c.bf16 %v2238_v13, %v2238_v13  ;;  %v2176_v41 = vld [vmem:[%s2849_s15 + $0x54] sm:$0xff]  ;;  %v2207_v45 = vld [vmem:[%s2849_s15 + $0x45] sm:$0xff] }
  0x2d   : > { %v2208_v44 = vld [vmem:[%s2849_s15 + $0x4d] sm:$0xff]  ;;  %v244_v49 = vld [vmem:[%s2849_s15 + $0x40] sm:$0xff]  ;;  %v2209_v51 = vld [vmem:[%s2849_s15 + $0x55] sm:$0xff] }
  0x2e   : > { %v245_v48 = vld [vmem:[%s2849_s15 + $0x48] sm:$0xff]  ;;  %v2432_v55 = vpack.c.bf16 %v2209_v51, %v2209_v51  ;;  %v247_v62 = vld [vmem:[%s2849_s15 + $0x58] sm:$0xff]  ;;  %v246_v63 = vld [vmem:[%s2849_s15 + $0x50] sm:$0xff] }
  0x2f   : > { %v2323_v52 = vpack.c.bf16 %v245_v48, %v245_v48  ;;  %v2241_v56 = vld [vmem:[%s2849_s15 + $0x4e] sm:$0xff]  ;;  %v2240_v57 = vld [vmem:[%s2849_s15 + $0x46] sm:$0xff]  ;;  %v2324_v3 = vpack.c.bf16 %v246_v63, %v246_v63  ;;  %v2243_v8 = vld [vmem:[%s2849_s15 + $0x5e] sm:$0xff] }
  0x30   : > { %667 = vrot.lane.b32.xlu1 %v2871_v21, %s2747_s27  ;;  %665 = vrot.lane.b32.xlu0 %v2877_v25, %s2747_s27  ;;  %v2446_v61 = vpack.c.bf16 %v2240_v57, %v2240_v57  ;;  %v2014_v0 = vld [vmem:[%s2849_s15 + $0x49] sm:$0xff]  ;;  %v2242_v9 = vld [vmem:[%s2849_s15 + $0x56] sm:$0xff]  ;;  %v2449_v12 = vpack.c.bf16 %v2243_v8, %v2243_v8 }
  0x31   : > { %326 = vst.msk [vmem:[#allocation2 + $0x24] sm:$0xf] %vm316_vm0, %v2323_v52  ;;  %327 = vst.msk [vmem:[#allocation2 + $0x28] sm:$0xf] %vm316_vm0, %v2324_v3  ;;  %v2339_v6 = vpack.c.bf16 %v2014_v0, %v2014_v0  ;;  %v2448_v13 = vpack.c.bf16 %v2242_v9, %v2242_v9  ;;  %v2148_v52 = vld [vmem:[%s2849_s15 + $0x6c] sm:$0xff]  ;;  %v2214_v8 = vld [vmem:[%s2849_s15 + $0x7d] sm:$0xff] }
  0x32   : > { %v2212_v0 = vld [vmem:[%s2849_s15 + $0x6d] sm:$0xff]  ;;  %v2213_v9 = vld [vmem:[%s2849_s15 + $0x75] sm:$0xff] }
  0x34   : > { %794 = vrot.lane.b32.xlu1 %v2379_v30, %s2748_s28  ;;  %792 = vrot.lane.b32.xlu0 %v2378_v31, %s2748_s28  ;;  %v2382_v31 = vpack.c.bf16 %v2108_v29, %v2108_v29 }
  0x38   : > { %798 = vrot.lane.b32.xlu1 %v2381_v34, %s2748_s28  ;;  %796 = vrot.lane.b32.xlu0 %v2380_v35, %s2748_s28  ;;  %v2385_v34 = vpack.c.bf16 %v2111_v32, %v2111_v32  ;;  %v2384_v35 = vpack.c.bf16 %v2110_v33, %v2110_v33  ;;  %v2082_v32 = vld [vmem:[%s2849_s15 + $0x6a] sm:$0xff] }
  0x3c   : > { %925 = vrot.lane.b32.xlu1 %v2395_v38, %s2749_s30  ;;  %923 = vrot.lane.b32.xlu0 %v2394_v39, %s2749_s30  ;;  %v2401_v38 = vpack.c.bf16 %v2144_v36, %v2144_v36  ;;  %v2400_v39 = vpack.c.bf16 %v2143_v37, %v2143_v37  ;;  %v2113_v36 = vld [vmem:[%s2849_s15 + $0x5b] sm:$0xff]  ;;  %v2112_v37 = vld [vmem:[%s2849_s15 + $0x53] sm:$0xff] }
  0x40   : > { %929 = vrot.lane.b32.xlu1 %v2397_v42, %s2749_s30  ;;  %927 = vrot.lane.b32.xlu0 %v2396_v43, %s2749_s30 }
  0x44   : > { %1056 = vrot.lane.b32.xlu1 %v2397_v42, %s2750_s6  ;;  %1054 = vrot.lane.b32.xlu0 %v2396_v43, %s2750_s6  ;;  %v2996_v42 = vpack.c.bf16 %v2177_v40, %v2177_v40  ;;  %v2998_v43 = vpack.c.bf16 %v2176_v41, %v2176_v41  ;;  %v2387_v40 = vpack.c.bf16 %v2113_v36, %v2113_v36  ;;  %v2246_v36 = vld [vmem:[%s2849_s15 + $0x76] sm:$0xff] }
  0x45   : > { %v2386_v41 = vpack.c.bf16 %v2112_v37, %v2112_v37 }
  0x48   : > { %1060 = vrot.lane.b32.xlu1 %v2907_v46, %s2750_s6  ;;  %1058 = vrot.lane.b32.xlu0 %v2909_v47, %s2750_s6 }
  0x4c   : > { %1187 = vrot.lane.b32.xlu1 %v2427_v50, %s2751_s10  ;;  %1185 = vrot.lane.b32.xlu0 %v2426_v53, %s2751_s10  ;;  %v2210_v50 = vld [vmem:[%s2849_s15 + $0x5d] sm:$0xff]  ;;  %v2322_v53 = vpack.c.bf16 %v244_v49, %v244_v49 }
  0x4d   : > { %v2433_v54 = vpack.c.bf16 %v2210_v50, %v2210_v50 }
  0x4e   : > { %325 = vst.msk [vmem:[#allocation2 + $0x20] sm:$0xf] %vm316_vm0, %v2322_v53  ;;  %v2147_v53 = vld [vmem:[%s2849_s15 + $0x64] sm:$0xff] }
  0x4f   : > { %v2404_v57 = vpack.c.bf16 %v2147_v53, %v2147_v53  ;;  %v2052_v53 = vld [vmem:[%s2849_s15 + $0x72] sm:$0xff] }
  0x50   : > { %1191 = vrot.lane.b32.xlu1 %v2429_v59, %s2751_s10  ;;  %1189 = vrot.lane.b32.xlu0 %v2428_v60, %s2751_s10  ;;  %v2447_v60 = vpack.c.bf16 %v2241_v56, %v2241_v56  ;;  %v2405_v56 = vpack.c.bf16 %v2148_v52, %v2148_v52  ;;  %v2053_v52 = vld [vmem:[%s2849_s15 + $0x7a] sm:$0xff] }
  0x54   : > { %1318 = vrot.lane.b32.xlu1 %v2443_v1, %s2752_s7  ;;  %1316 = vrot.lane.b32.xlu0 %v2442_v2, %s2752_s7  ;;  %v2013_v1 = vld [vmem:[%s2849_s15 + $0x41] sm:$0xff]  ;;  %v2325_v2 = vpack.c.bf16 %v247_v62, %v247_v62 }
  0x55   : > { %v2338_v7 = vpack.c.bf16 %v2013_v1, %v2013_v1  ;;  %v2211_v1 = vld [vmem:[%s2849_s15 + $0x65] sm:$0xff] }
  0x56   : > { %328 = vst.msk [vmem:[#allocation2 + $0x2c] sm:$0xf] %vm316_vm0, %v2325_v2 }
  0x58   : > { %409 = vrot.lane.b32.xlu1 %v2335_v10, %s2745_s16  ;;  %407 = vrot.lane.b32.xlu0 %v2334_v11, %s2745_s16 }
  0x5c   : > { %1322 = vrot.lane.b32.xlu1 %v2445_v14, %s2752_s7  ;;  %1320 = vrot.lane.b32.xlu0 %v2444_v15, %s2752_s7  ;;  %v2016_v14 = vld [vmem:[%s2849_s15 + $0x59] sm:$0xff]  ;;  %v2015_v15 = vld [vmem:[%s2849_s15 + $0x51] sm:$0xff] }
  0x60   : > { %413 = vrot.lane.b32.xlu1 %v2337_v18, %s2745_s16  ;;  %411 = vrot.lane.b32.xlu0 %v2336_v19, %s2745_s16  ;;  %v2341_v18 = vpack.c.bf16 %v2016_v14, %v2016_v14  ;;  %v2340_v19 = vpack.c.bf16 %v2015_v15, %v2015_v15  ;;  %v2437_v14 = vpack.c.bf16 %v2214_v8, %v2214_v8 }
  0x61   : > { %v2436_v15 = vpack.c.bf16 %v2213_v9, %v2213_v9 }
  0x64   : > { %540 = vrot.lane.b32.xlu1 %v2871_v21, %s2746_s17  ;;  %538 = vrot.lane.b32.xlu0 %v2877_v25, %s2746_s17  ;;  %v2970_v21 = vpack.c.bf16 %v2077_v27, %v2077_v27  ;;  %v2109_v25 = vld [vmem:[%s2849_s15 + $0x3b] sm:$0xff] }
  0x65   : > { %v2383_v30 = vpack.c.bf16 %v2109_v25, %v2109_v25 }
  0x68   : > { %544 = vrot.lane.b32.xlu1 %v2353_v23, %s2746_s17  ;;  %542 = vrot.lane.b32.xlu0 %v2352_v24, %s2746_s17 }
  0x6c   : > { %671 = vrot.lane.b32.xlu1 %v2353_v23, %s2747_s27  ;;  %669 = vrot.lane.b32.xlu0 %v2352_v24, %s2747_s27  ;;  %v2049_v23 = vld [vmem:[%s2849_s15 + $0x5a] sm:$0xff]  ;;  %v2048_v24 = vld [vmem:[%s2849_s15 + $0x52] sm:$0xff] }
  0x6d   : > { %v2357_v25 = vpack.c.bf16 %v2049_v23, %v2049_v23  ;;  %v2356_v29 = vpack.c.bf16 %v2048_v24, %v2048_v24  ;;  %v251_v24 = vld [vmem:[%s2849_s15 + $0x78] sm:$0xff] }
  0x70   : > { %675 = vrot.lane.b32.xlu1 %v2968_v28, %s2747_s27  ;;  %673 = vrot.lane.b32.xlu0 %v2970_v21, %s2747_s27 }
  0x74   : > { %802 = vrot.lane.b32.xlu1 %v2383_v30, %s2748_s28  ;;  %800 = vrot.lane.b32.xlu0 %v2382_v31, %s2748_s28 }
  0x78   : > { %806 = vrot.lane.b32.xlu1 %v2385_v34, %s2748_s28  ;;  %804 = vrot.lane.b32.xlu0 %v2384_v35, %s2748_s28 }
  0x7c   : > { %933 = vrot.lane.b32.xlu1 %v2907_v46, %s2749_s30  ;;  %931 = vrot.lane.b32.xlu0 %v2909_v47, %s2749_s30  ;;  %v2431_v46 = vpack.c.bf16 %v2208_v44, %v2208_v44  ;;  %v2430_v47 = vpack.c.bf16 %v2207_v45, %v2207_v45  ;;  %v2115_v44 = vld [vmem:[%s2849_s15 + $0x6b] sm:$0xff]  ;;  %v2114_v45 = vld [vmem:[%s2849_s15 + $0x63] sm:$0xff] }
  0x7d   : > { %v2389_v48 = vpack.c.bf16 %v2115_v44, %v2115_v44  ;;  %v2388_v49 = vpack.c.bf16 %v2114_v45, %v2114_v45  ;;  %v2020_v44 = vld [vmem:[%s2849_s15 + $0x79] sm:$0xff]  ;;  %v2019_v45 = vld [vmem:[%s2849_s15 + $0x71] sm:$0xff] }
  0x80   : > { %937 = vrot.lane.b32.xlu1 %v2401_v38, %s2749_s30  ;;  %935 = vrot.lane.b32.xlu0 %v2400_v39, %s2749_s30 }
  0x84   : > { %1064 = vrot.lane.b32.xlu1 %v2401_v38, %s2750_s6  ;;  %1062 = vrot.lane.b32.xlu0 %v2400_v39, %s2750_s6 }
  0x88   : > { %1068 = vrot.lane.b32.xlu1 %v2996_v42, %s2750_s6  ;;  %1066 = vrot.lane.b32.xlu0 %v2998_v43, %s2750_s6 }
  0x8c   : > { %1195 = vrot.lane.b32.xlu1 %v2431_v46, %s2751_s10  ;;  %1193 = vrot.lane.b32.xlu0 %v2430_v47, %s2751_s10 }
  0x8e   : > { %v404_v58 = vpop.permute.xlu1 %403  ;;  %v400_v59 = vpop.permute.xlu0 %399 }
  0x8f   : > { %450 = vst.msk [vmem:[#allocation2 + $0x8] sm:$0xf] %vm447_vm2, %v404_v58  ;;  %448 = vst.msk [vmem:[#allocation2] sm:$0xf] %vm447_vm2, %v400_v59 }
  0x90   : > { %1199 = vrot.lane.b32.xlu1 %v2433_v54, %s2751_s10  ;;  %1197 = vrot.lane.b32.xlu0 %v2432_v55, %s2751_s10 }
  0x92   : > { %v406_v4 = vpop.permute.xlu1 %405  ;;  %v402_v5 = vpop.permute.xlu0 %401 }
  0x93   : > { %451 = vst.msk [vmem:[#allocation2 + $0xc] sm:$0xf] %vm447_vm2, %v406_v4  ;;  %449 = vst.msk [vmem:[#allocation2 + $0x4] sm:$0xf] %vm447_vm2, %v402_v5  ;;  %v2435_v4 = vpack.c.bf16 %v2212_v0, %v2212_v0  ;;  %v2434_v5 = vpack.c.bf16 %v2211_v1, %v2211_v1  ;;  %v2117_v0 = vld [vmem:[%s2849_s15 + $0x7b] sm:$0xff]  ;;  %v2116_v1 = vld [vmem:[%s2849_s15 + $0x73] sm:$0xff] }
  0x94   : > { %1326 = vrot.lane.b32.xlu1 %v2447_v60, %s2752_s7  ;;  %1324 = vrot.lane.b32.xlu0 %v2446_v61, %s2752_s7  ;;  %v2181_v60 = vld [vmem:[%s2849_s15 + $0x7c] sm:$0xff] }
  0x96   : > { %v533_v10 = vpop.permute.xlu1 %532  ;;  %v531_v11 = vpop.permute.xlu0 %530 }
  0x97   : > { %580 = vst.msk [vmem:[#allocation2 + $0x4] sm:$0xf] %vm578_vm3, %v533_v10  ;;  %579 = vst.msk [vmem:[#allocation2] sm:$0xf] %vm578_vm3, %v531_v11 }
  0x98   : > { %417 = vrot.lane.b32.xlu1 %v2339_v6, %s2745_s16  ;;  %415 = vrot.lane.b32.xlu0 %v2338_v7, %s2745_s16  ;;  %v249_v6 = vld [vmem:[%s2849_s15 + $0x68] sm:$0xff]  ;;  %v248_v7 = vld [vmem:[%s2849_s15 + $0x60] sm:$0xff] }
  0x99   : > { %v2327_v10 = vpack.c.bf16 %v249_v6, %v249_v6  ;;  %v2326_v11 = vpack.c.bf16 %v248_v7, %v248_v7  ;;  %v2119_v6 = vld [vmem:[%s2849_s15 + $0x8b] sm:$0xff]  ;;  %v2118_v7 = vld [vmem:[%s2849_s15 + $0x83] sm:$0xff] }
  0x9a   : > { %v537_v16 = vpop.permute.xlu1 %536  ;;  %v535_v17 = vpop.permute.xlu0 %534 }
  0x9b   : > { %582 = vst.msk [vmem:[#allocation2 + $0xc] sm:$0xf] %vm578_vm3, %v537_v16  ;;  %581 = vst.msk [vmem:[#allocation2 + $0x8] sm:$0xf] %vm578_vm3, %v535_v17  ;;  %v2245_v16 = vld [vmem:[%s2849_s15 + $0x6e] sm:$0xff]  ;;  %v2244_v17 = vld [vmem:[%s2849_s15 + $0x66] sm:$0xff] }
  0x9c   : > { %1330 = vrot.lane.b32.xlu1 %v2449_v12, %s2752_s7  ;;  %1328 = vrot.lane.b32.xlu0 %v2448_v13, %s2752_s7  ;;  %330 = vst.msk [vmem:[#allocation2 + $0x34] sm:$0xf] %vm316_vm0, %v2327_v10  ;;  %329 = vst.msk [vmem:[#allocation2 + $0x30] sm:$0xf] %vm316_vm0, %v2326_v11  ;;  %v2450_v23 = vpack.c.bf16 %v2244_v17, %v2244_v17  ;;  %v2393_v10 = vpack.c.bf16 %v2119_v6, %v2119_v6 }
  0x9d   : > { %v2392_v11 = vpack.c.bf16 %v2118_v7, %v2118_v7 }
  0x9e   : > { %v664_v20 = vpop.permute.xlu1 %663  ;;  %v662_v22 = vpop.permute.xlu0 %661 }
  0x9f   : > { %711 = vst.msk [vmem:[#allocation2 + $0x4] sm:$0xf] %vm709_vm4, %v664_v20  ;;  %710 = vst.msk [vmem:[#allocation2] sm:$0xf] %vm709_vm4, %v662_v22  ;;  %v2451_v22 = vpack.c.bf16 %v2245_v16, %v2245_v16 }
  0xa0   : > { %421 = vrot.lane.b32.xlu1 %v2341_v18, %s2745_s16  ;;  %419 = vrot.lane.b32.xlu0 %v2340_v19, %s2745_s16 }
  0xa2   : > { %v668_v26 = vpop.permute.xlu1 %667  ;;  %v666_v27 = vpop.permute.xlu0 %665 }
  0xa3   : > { %713 = vst.msk [vmem:[#allocation2 + $0xc] sm:$0xf] %vm709_vm4, %v668_v26  ;;  %712 = vst.msk [vmem:[#allocation2 + $0x8] sm:$0xf] %vm709_vm4, %v666_v27  ;;  %v250_v26 = vld [vmem:[%s2849_s15 + $0x70] sm:$0xff] }
  0xa4   : > { %548 = vrot.lane.b32.xlu1 %v2968_v28, %s2746_s17  ;;  %546 = vrot.lane.b32.xlu0 %v2970_v21, %s2746_s17  ;;  %v2081_v28 = vld [vmem:[%s2849_s15 + $0x62] sm:$0xff]  ;;  %v3064_v21 = vpack.c.bf16 %v2082_v32, %v2082_v32 }
  0xa5   : > { %v3066_v35 = vpack.c.bf16 %v2081_v28, %v2081_v28  ;;  %v2018_v27 = vld [vmem:[%s2849_s15 + $0x69] sm:$0xff] }
  0xa6   : > { %v795_v30 = vpop.permute.xlu1 %794  ;;  %v793_v31 = vpop.permute.xlu0 %792  ;;  %v2343_v28 = vpack.c.bf16 %v2018_v27, %v2018_v27 }
  0xa7   : > { %842 = vst.msk [vmem:[#allocation2 + $0x4] sm:$0xf] %vm840_vm5, %v795_v30  ;;  %841 = vst.msk [vmem:[#allocation2] sm:$0xf] %vm840_vm5, %v793_v31  ;;  %v2328_v30 = vpack.c.bf16 %v250_v26, %v250_v26 }
  0xa8   : > { %552 = vrot.lane.b32.xlu1 %v2357_v25, %s2746_s17  ;;  %550 = vrot.lane.b32.xlu0 %v2356_v29, %s2746_s17 }
  0xa9   : > { %331 = vst.msk [vmem:[#allocation2 + $0x38] sm:$0xf] %vm316_vm0, %v2328_v30 }
  0xaa   : > { %v799_v33 = vpop.permute.xlu1 %798  ;;  %v797_v34 = vpop.permute.xlu0 %796 }
  0xab   : > { %844 = vst.msk [vmem:[#allocation2 + $0xc] sm:$0xf] %vm840_vm5, %v799_v33  ;;  %843 = vst.msk [vmem:[#allocation2 + $0x8] sm:$0xf] %vm840_vm5, %v797_v34  ;;  %v2247_v34 = vld [vmem:[%s2849_s15 + $0x7e] sm:$0xff] }
  0xac   : > { %679 = vrot.lane.b32.xlu1 %v2357_v25, %s2747_s27  ;;  %677 = vrot.lane.b32.xlu0 %v2356_v29, %s2747_s27  ;;  %v2017_v25 = vld [vmem:[%s2849_s15 + $0x61] sm:$0xff]  ;;  %v2329_v29 = vpack.c.bf16 %v251_v24, %v251_v24  ;;  %v2184_v24 = vld [vmem:[%s2849_s15 + $0x94] sm:$0xff] }
  0xad   : > { %v2342_v33 = vpack.c.bf16 %v2017_v25, %v2017_v25  ;;  %v2424_v27 = vpack.c.bf16 %v2184_v24, %v2184_v24  ;;  %v2216_v25 = vld [vmem:[%s2849_s15 + $0x8d] sm:$0xff] }
  0xae   : > { %v926_v38 = vpop.permute.xlu1 %925  ;;  %v924_v39 = vpop.permute.xlu0 %923  ;;  %332 = vst.msk [vmem:[#allocation2 + $0x3c] sm:$0xf] %vm316_vm0, %v2329_v29  ;;  %v2215_v29 = vld [vmem:[%s2849_s15 + $0x85] sm:$0xff] }
  0xaf   : > { %973 = vst.msk [vmem:[#allocation2 + $0x4] sm:$0xf] %vm971_vm6, %v926_v38  ;;  %972 = vst.msk [vmem:[#allocation2] sm:$0xf] %vm971_vm6, %v924_v39 }
  0xb0   : > { %683 = vrot.lane.b32.xlu1 %v3064_v21, %s2747_s27  ;;  %681 = vrot.lane.b32.xlu0 %v3066_v35, %s2747_s27 }
  0xb2   : > { %v930_v46 = vpop.permute.xlu1 %929  ;;  %v928_v47 = vpop.permute.xlu0 %927 }
  0xb3   : > { %975 = vst.msk [vmem:[#allocation2 + $0xc] sm:$0xf] %vm971_vm6, %v930_v46  ;;  %974 = vst.msk [vmem:[#allocation2 + $0x8] sm:$0xf] %vm971_vm6, %v928_v47 }
  0xb4   : > { %810 = vrot.lane.b32.xlu1 %v2387_v40, %s2748_s28  ;;  %808 = vrot.lane.b32.xlu0 %v2386_v41, %s2748_s28  ;;  %v2453_v40 = vpack.c.bf16 %v2247_v34, %v2247_v34  ;;  %v2452_v41 = vpack.c.bf16 %v2246_v36, %v2246_v36  ;;  %v2217_v34 = vld [vmem:[%s2849_s15 + $0x95] sm:$0xff] }
  0xb6   : > { %v1057_v50 = vpop.permute.xlu1 %1056  ;;  %v1055_v51 = vpop.permute.xlu0 %1054 }
  0xb7   : > { %1104 = vst.msk [vmem:[#allocation2 + $0x4] sm:$0xf] %vm1102_vm7, %v1057_v50  ;;  %1103 = vst.msk [vmem:[#allocation2] sm:$0xf] %vm1102_vm7, %v1055_v51 }
  0xb8   : > { %814 = vrot.lane.b32.xlu1 %v2389_v48, %s2748_s28  ;;  %812 = vrot.lane.b32.xlu0 %v2388_v49, %s2748_s28  ;;  %v2345_v48 = vpack.c.bf16 %v2020_v44, %v2020_v44  ;;  %v2344_v49 = vpack.c.bf16 %v2019_v45, %v2019_v45 }
  0xba   : > { %v1061_v54 = vpop.permute.xlu1 %1060  ;;  %v1059_v55 = vpop.permute.xlu0 %1058 }
  0xbb   : > { %1106 = vst.msk [vmem:[#allocation2 + $0xc] sm:$0xf] %vm1102_vm7, %v1061_v54  ;;  %1105 = vst.msk [vmem:[#allocation2 + $0x8] sm:$0xf] %vm1102_vm7, %v1059_v55 }
  0xbc   : > { %941 = vrot.lane.b32.xlu1 %v2996_v42, %s2749_s30  ;;  %939 = vrot.lane.b32.xlu0 %v2998_v43, %s2749_s30  ;;  %v2180_v42 = vld [vmem:[%s2849_s15 + $0x74] sm:$0xff]  ;;  %v3104_v43 = vpack.c.bf16 %v2181_v60, %v2181_v60  ;;  %v2086_v60 = vld [vmem:[%s2849_s15 + $0x8a] sm:$0xff] }
  0xbd   : > { %v3106_v63 = vpack.c.bf16 %v2180_v42, %v2180_v42  ;;  %v2085_v42 = vld [vmem:[%s2849_s15 + $0x82] sm:$0xff] }
  0xbe   : > { %v1188_v58 = vpop.permute.xlu1 %1187  ;;  %v1186_v59 = vpop.permute.xlu0 %1185 }
  0xbf   : > { %1235 = vst.msk [vmem:[#allocation2 + $0x4] sm:$0xf] %vm1233_vm8, %v1188_v58  ;;  %1234 = vst.msk [vmem:[#allocation2] sm:$0xf] %vm1233_vm8, %v1186_v59 }
  0xc0   : > { %945 = vrot.lane.b32.xlu1 %v2405_v56, %s2749_s30  ;;  %943 = vrot.lane.b32.xlu0 %v2404_v57, %s2749_s30 }
  0xc2   : > { %v1192_v61 = vpop.permute.xlu1 %1191  ;;  %v1190_v62 = vpop.permute.xlu0 %1189 }
  0xc3   : > { %1237 = vst.msk [vmem:[#allocation2 + $0xc] sm:$0xf] %vm1233_vm8, %v1192_v61  ;;  %1236 = vst.msk [vmem:[#allocation2 + $0x8] sm:$0xf] %vm1233_vm8, %v1190_v62  ;;  %v2376_v62 = vpack.c.bf16 %v2085_v42, %v2085_v42 }
  0xc4   : > { %1072 = vrot.lane.b32.xlu1 %v2405_v56, %s2750_s6  ;;  %1070 = vrot.lane.b32.xlu0 %v2404_v57, %s2750_s6  ;;  %v2361_v56 = vpack.c.bf16 %v2053_v52, %v2053_v52  ;;  %v2360_v57 = vpack.c.bf16 %v2052_v53, %v2052_v53 }
  0xc6   : > { %v1319_v2 = vpop.permute.xlu1 %1318  ;;  %v1317_v3 = vpop.permute.xlu0 %1316 }
  0xc7   : > { %1366 = vst.msk [vmem:[#allocation2 + $0x4] sm:$0xf] %vm1364_vm9, %v1319_v2  ;;  %1365 = vst.msk [vmem:[#allocation2] sm:$0xf] %vm1364_vm9, %v1317_v3 }
  0xc8   : > { %1076 = vrot.lane.b32.xlu1 %v3104_v43, %s2750_s6  ;;  %1074 = vrot.lane.b32.xlu0 %v3106_v63, %s2750_s6 }
  0xca   : > { %v410_v12 = vpop.permute.xlu1 %409  ;;  %v408_v13 = vpop.permute.xlu0 %407 }
  0xcb   : > { %453 = vst.msk [vmem:[#allocation2 + $0x14] sm:$0xf] %vm447_vm2, %v410_v12  ;;  %452 = vst.msk [vmem:[#allocation2 + $0x10] sm:$0xf] %vm447_vm2, %v408_v13 }
  0xcc   : > { %1203 = vrot.lane.b32.xlu1 %v2435_v4, %s2751_s10  ;;  %1201 = vrot.lane.b32.xlu0 %v2434_v5, %s2751_s10  ;;  %v2391_v4 = vpack.c.bf16 %v2117_v0, %v2117_v0  ;;  %v2390_v5 = vpack.c.bf16 %v2116_v1, %v2116_v1 }
  0xce   : > { %v1323_v18 = vpop.permute.xlu1 %1322  ;;  %v1321_v19 = vpop.permute.xlu0 %1320  ;;  %v2602_v20 = vld [vmem:[#allocation2] sm:$0xff]  }
  0xcf   : > { %1368 = vst.msk [vmem:[#allocation2 + $0xc] sm:$0xf] %vm1364_vm9, %v1323_v18  ;;  %1367 = vst.msk [vmem:[#allocation2 + $0x8] sm:$0xf] %vm1364_vm9, %v1321_v19  ;;  %2485 = vmatprep.mubr.msk.bf16.mxu0 %vm1464_vm10, %v2602_v20 }
  0xd0   : > { %1207 = vrot.lane.b32.xlu1 %v2437_v14, %s2751_s10  ;;  %1205 = vrot.lane.b32.xlu0 %v2436_v15, %s2751_s10  ;;  %v2152_v14 = vld [vmem:[%s2849_s15 + $0x8c] sm:$0xff]  ;;  %v2151_v15 = vld [vmem:[%s2849_s15 + $0x84] sm:$0xff] }
  0xd1   : > { %v2409_v18 = vpack.c.bf16 %v2152_v14, %v2152_v14  ;;  %v2408_v19 = vpack.c.bf16 %v2151_v15, %v2151_v15 }
  0xd2   : > { %v414_v31 = vpop.permute.xlu1 %413  ;;  %v412_v32 = vpop.permute.xlu0 %411 }
  0xd3   : > { %455 = vst.msk [vmem:[#allocation2 + $0x1c] sm:$0xf] %vm447_vm2, %v414_v31  ;;  %454 = vst.msk [vmem:[#allocation2 + $0x18] sm:$0xf] %vm447_vm2, %v412_v32  ;;  %v2439_v32 = vpack.c.bf16 %v2216_v25, %v2216_v25 }
  0xd4   : > { %1334 = vrot.lane.b32.xlu1 %v2451_v22, %s2752_s7  ;;  %1332 = vrot.lane.b32.xlu0 %v2450_v23, %s2752_s7  ;;  %v2185_v23 = vld [vmem:[%s2849_s15 + $0x9c] sm:$0xff] }
  0xd6   : > { %v541_v37 = vpop.permute.xlu1 %540  ;;  %v539_v38 = vpop.permute.xlu0 %538  ;;  %v2604_v39 = vld [vmem:[#allocation2 + $0x8] sm:$0xff]  }
  0xd7   : > { %584 = vst.msk [vmem:[#allocation2 + $0x14] sm:$0xf] %vm578_vm3, %v541_v37  ;;  %583 = vst.msk [vmem:[#allocation2 + $0x10] sm:$0xf] %vm578_vm3, %v539_v38  ;;  %2486 = vmatmul.mubr.msk.bf16.vlgmr.msra.gmra.mxu0 %vm1464_vm10, %v2604_v39  ;;  %v2440_v39 = vpack.c.bf16 %v2217_v34, %v2217_v34 }
  0xd8   : > { %425 = vrot.lane.b32.xlu1 %v2343_v28, %s2745_s16  ;;  %423 = vrot.lane.b32.xlu0 %v2342_v33, %s2745_s16  ;;  %v2438_v28 = vpack.c.bf16 %v2215_v29, %v2215_v29  ;;  %v2218_v33 = vld [vmem:[%s2849_s15 + $0x9d] sm:$0xff] }
  0xd9   : > { %v2441_v38 = vpack.c.bf16 %v2218_v33, %v2218_v33 }
  0xda   : > { %v545_v46 = vpop.permute.xlu1 %544  ;;  %v543_v47 = vpop.permute.xlu0 %542 }
  0xdb   : > { %586 = vst.msk [vmem:[#allocation2 + $0x1c] sm:$0xf] %vm578_vm3, %v545_v46  ;;  %585 = vst.msk [vmem:[#allocation2 + $0x18] sm:$0xf] %vm578_vm3, %v543_v47 }
  0xdc   : > { %1338 = vrot.lane.b32.xlu1 %v2453_v40, %s2752_s7  ;;  %1336 = vrot.lane.b32.xlu0 %v2452_v41, %s2752_s7  ;;  %v2249_v40 = vld [vmem:[%s2849_s15 + $0x8e] sm:$0xff]  ;;  %v2248_v41 = vld [vmem:[%s2849_s15 + $0x86] sm:$0xff] }
  0xdd   : > { %v2455_v47 = vpack.c.bf16 %v2249_v40, %v2249_v40 }
  0xde   : > { %v672_v50 = vpop.permute.xlu1 %671  ;;  %v670_v51 = vpop.permute.xlu0 %669 }
  0xdf   : > { %715 = vst.msk [vmem:[#allocation2 + $0x14] sm:$0xf] %vm709_vm4, %v672_v50  ;;  %714 = vst.msk [vmem:[#allocation2 + $0x10] sm:$0xf] %vm709_vm4, %v670_v51  ;;  %v2250_v50 = vld [vmem:[%s2849_s15 + $0x96] sm:$0xff] }
  0xe0   : > { %429 = vrot.lane.b32.xlu1 %v2345_v48, %s2745_s16  ;;  %427 = vrot.lane.b32.xlu0 %v2344_v49, %s2745_s16  ;;  %v2454_v48 = vpack.c.bf16 %v2248_v41, %v2248_v41  ;;  %v2251_v49 = vld [vmem:[%s2849_s15 + $0x9e] sm:$0xff]  ;;  %s2532_s16 = smul.u32 (%p2830_p5), 9, %s2731_s21 }
  0xe1   : > { %v2457_v53 = vpack.c.bf16 %v2251_v49, %v2251_v49 }
  0xe2   : > { %v676_v54 = vpop.permute.xlu1 %675  ;;  %v674_v55 = vpop.permute.xlu0 %673 }
  0xe3   : > { %717 = vst.msk [vmem:[#allocation2 + $0x1c] sm:$0xf] %vm709_vm4, %v676_v54  ;;  %716 = vst.msk [vmem:[#allocation2 + $0x18] sm:$0xf] %vm709_vm4, %v674_v55  ;;  %v2456_v54 = vpack.c.bf16 %v2250_v50, %v2250_v50 }
  0xe4   : > { %556 = vrot.lane.b32.xlu1 %v3064_v21, %s2746_s17  ;;  %554 = vrot.lane.b32.xlu0 %v3066_v35, %s2746_s17  ;;  %v2377_v35 = vpack.c.bf16 %v2086_v60, %v2086_v60 }
  0xe6   : > { %v803_v58 = vpop.permute.xlu1 %802  ;;  %v801_v59 = vpop.permute.xlu0 %800 }
  0xe7   : > { %846 = vst.msk [vmem:[#allocation2 + $0x14] sm:$0xf] %vm840_vm5, %v803_v58  ;;  %845 = vst.msk [vmem:[#allocation2 + $0x10] sm:$0xf] %vm840_vm5, %v801_v59 }
  0xe8   : > { %560 = vrot.lane.b32.xlu1 %v2361_v56, %s2746_s17  ;;  %558 = vrot.lane.b32.xlu0 %v2360_v57, %s2746_s17  ;;  %s1847_s17 = sadd.s32 (%p2830_p5), %s2727_s20, %s2532_s16 }
  0xe9   : > { %s2311_s18 = sshll.u32 (%p2830_p5), %s1847_s17, 3 }
  0xea   : > { %v807_v21 = vpop.permute.xlu1 %806  ;;  %v805_v61 = vpop.permute.xlu0 %804 }
  0xeb   : > { %848 = vst.msk [vmem:[#allocation2 + $0x1c] sm:$0xf] %vm840_vm5, %v807_v21  ;;  %847 = vst.msk [vmem:[#allocation2 + $0x18] sm:$0xf] %vm840_vm5, %v805_v61 }
  0xec   : > { %687 = vrot.lane.b32.xlu1 %v2361_v56, %s2747_s27  ;;  %685 = vrot.lane.b32.xlu0 %v2360_v57, %s2747_s27 }
  0xee   : > { %v934_v2 = vpop.permute.xlu1 %933  ;;  %v932_v3 = vpop.permute.xlu0 %931 }
  0xef   : > { %977 = vst.msk [vmem:[#allocation2 + $0x14] sm:$0xf] %vm971_vm6, %v934_v2  ;;  %976 = vst.msk [vmem:[#allocation2 + $0x10] sm:$0xf] %vm971_vm6, %v932_v3 }
  0xf0   : > { %691 = vrot.lane.b32.xlu1 %v2377_v35, %s2747_s27  ;;  %689 = vrot.lane.b32.xlu0 %v2376_v62, %s2747_s27 }
  0xf2   : > { %v938_v8 = vpop.permute.xlu1 %937  ;;  %v936_v9 = vpop.permute.xlu0 %935 }
  0xf3   : > { %979 = vst.msk [vmem:[#allocation2 + $0x1c] sm:$0xf] %vm971_vm6, %v938_v8  ;;  %978 = vst.msk [vmem:[#allocation2 + $0x18] sm:$0xf] %vm971_vm6, %v936_v9 }
  0xf4   : > { %818 = vrot.lane.b32.xlu1 %v2391_v4, %s2748_s28  ;;  %816 = vrot.lane.b32.xlu0 %v2390_v5, %s2748_s28 }
  0xf6   : > { %v1065_v12 = vpop.permute.xlu1 %1064  ;;  %v1063_v13 = vpop.permute.xlu0 %1062 }
  0xf7   : > { %1108 = vst.msk [vmem:[#allocation2 + $0x14] sm:$0xf] %vm1102_vm7, %v1065_v12  ;;  %1107 = vst.msk [vmem:[#allocation2 + $0x10] sm:$0xf] %vm1102_vm7, %v1063_v13 }
  0xf8   : > { %822 = vrot.lane.b32.xlu1 %v2393_v10, %s2748_s28  ;;  %820 = vrot.lane.b32.xlu0 %v2392_v11, %s2748_s28 }
  0xfa   : > { %v1069_v16 = vpop.permute.xlu1 %1068  ;;  %v1067_v17 = vpop.permute.xlu0 %1066 }
  0xfb   : > { %1110 = vst.msk [vmem:[#allocation2 + $0x1c] sm:$0xf] %vm1102_vm7, %v1069_v16  ;;  %1109 = vst.msk [vmem:[#allocation2 + $0x18] sm:$0xf] %vm1102_vm7, %v1067_v17 }
  0xfc   : > { %949 = vrot.lane.b32.xlu1 %v3104_v43, %s2749_s30  ;;  %947 = vrot.lane.b32.xlu0 %v3106_v63, %s2749_s30  ;;  %v2425_v63 = vpack.c.bf16 %v2185_v23, %v2185_v23 }
  0xfe   : > { %v1196_v20 = vpop.permute.xlu1 %1195  ;;  %v1194_v22 = vpop.permute.xlu0 %1193 }
  0xff   : > { %1239 = vst.msk [vmem:[#allocation2 + $0x14] sm:$0xf] %vm1233_vm8, %v1196_v20  ;;  %1238 = vst.msk [vmem:[#allocation2 + $0x10] sm:$0xf] %vm1233_vm8, %v1194_v22 }
 0x100   : > { %953 = vrot.lane.b32.xlu1 %v2409_v18, %s2749_s30  ;;  %951 = vrot.lane.b32.xlu0 %v2408_v19, %s2749_s30  ;;  %s1849_s30 = scalar_lea.vmem (%p2830_p5), %s3443_s5, %s2311_s18 }
 0x102   : > { %v1200_v43 = vpop.permute.xlu1 %1199  ;;  %v1198_v26 = vpop.permute.xlu0 %1197 }
 0x103   : > { %1241 = vst.msk [vmem:[#allocation2 + $0x1c] sm:$0xf] %vm1233_vm8, %v1200_v43  ;;  %1240 = vst.msk [vmem:[#allocation2 + $0x18] sm:$0xf] %vm1233_vm8, %v1198_v26 }
 0x104   : > { %1080 = vrot.lane.b32.xlu1 %v2409_v18, %s2750_s6  ;;  %1078 = vrot.lane.b32.xlu0 %v2408_v19, %s2750_s6 }
 0x106   : > { %v1327_v30 = vpop.permute.xlu1 %1326  ;;  %v1325_v31 = vpop.permute.xlu0 %1324 }
 0x107   : > { %1370 = vst.msk [vmem:[#allocation2 + $0x14] sm:$0xf] %vm1364_vm9, %v1327_v30  ;;  %1369 = vst.msk [vmem:[#allocation2 + $0x10] sm:$0xf] %vm1364_vm9, %v1325_v31 }
 0x108   : > { %1084 = vrot.lane.b32.xlu1 %v2425_v63, %s2750_s6  ;;  %1082 = vrot.lane.b32.xlu0 %v2424_v27, %s2750_s6 }
 0x10a   : > { %v418_v36 = vpop.permute.xlu1 %417  ;;  %v416_v37 = vpop.permute.xlu0 %415 }
 0x10b   : > { %457 = vst.msk [vmem:[#allocation2 + $0x24] sm:$0xf] %vm447_vm2, %v418_v36  ;;  %456 = vst.msk [vmem:[#allocation2 + $0x20] sm:$0xf] %vm447_vm2, %v416_v37 }
 0x10c   : > { %1211 = vrot.lane.b32.xlu1 %v2439_v32, %s2751_s10  ;;  %1209 = vrot.lane.b32.xlu0 %v2438_v28, %s2751_s10 }
 0x10e   : > { %v1331_v44 = vpop.permute.xlu1 %1330  ;;  %v1329_v45 = vpop.permute.xlu0 %1328  ;;  %v2605_v46 = vld [vmem:[#allocation2 + $0x10] sm:$0xff]  }
 0x10f   : > { %1372 = vst.msk [vmem:[#allocation2 + $0x1c] sm:$0xf] %vm1364_vm9, %v1331_v44  ;;  %1371 = vst.msk [vmem:[#allocation2 + $0x18] sm:$0xf] %vm1364_vm9, %v1329_v45  ;;  %2489 = vmatprep.mubr.msk.bf16.mxu0 %vm1464_vm10, %v2605_v46 }
 0x110   : > { %1215 = vrot.lane.b32.xlu1 %v2441_v38, %s2751_s10  ;;  %1213 = vrot.lane.b32.xlu0 %v2440_v39, %s2751_s10 }
 0x112   : > { %v422_v51 = vpop.permute.xlu1 %421  ;;  %v420_v52 = vpop.permute.xlu0 %419 }
 0x113   : > { %459 = vst.msk [vmem:[#allocation2 + $0x2c] sm:$0xf] %vm447_vm2, %v422_v51  ;;  %458 = vst.msk [vmem:[#allocation2 + $0x28] sm:$0xf] %vm447_vm2, %v420_v52 }
 0x114   : > { %1342 = vrot.lane.b32.xlu1 %v2455_v47, %s2752_s7  ;;  %1340 = vrot.lane.b32.xlu0 %v2454_v48, %s2752_s7 }
 0x116   : > { %v549_v55 = vpop.permute.xlu1 %548  ;;  %v547_v56 = vpop.permute.xlu0 %546  ;;  %v2606_v57 = vld [vmem:[#allocation2 + $0x18] sm:$0xff]  }
 0x117   : > { %588 = vst.msk [vmem:[#allocation2 + $0x24] sm:$0xf] %vm578_vm3, %v549_v55  ;;  %587 = vst.msk [vmem:[#allocation2 + $0x20] sm:$0xf] %vm578_vm3, %v547_v56  ;;  %2490 = vmatmul.mubr.msk.bf16.gmra.mxu0 %vm1464_vm10, %v2606_v57  ;;  %v3307_v56 = vld [vmem:[%s3440_s2] ss:$0 sm:$0xff] }
 0x118   : > { %1346 = vrot.lane.b32.xlu1 %v2457_v53, %s2752_s7  ;;  %1344 = vrot.lane.b32.xlu0 %v2456_v54, %s2752_s7  ;;  %s2530_s7 = smul.u32 24, %s225_s14 }
 0x11a   : > { %v553_v58 = vpop.permute.xlu1 %552  ;;  %v551_v59 = vpop.permute.xlu0 %550  ;;  %s227_s15 = scalar_lea.vmem [#allocation3], %s2530_s7 }
 0x11b   : > { %590 = vst.msk [vmem:[#allocation2 + $0x2c] sm:$0xf] %vm578_vm3, %v553_v58  ;;  %589 = vst.msk [vmem:[#allocation2 + $0x28] sm:$0xf] %vm578_vm3, %v551_v59 }
 0x11e   : > { %v680_v60 = vpop.permute.xlu1 %679  ;;  %v678_v42 = vpop.permute.xlu0 %677 }
 0x11f   : > { %719 = vst.msk [vmem:[#allocation2 + $0x24] sm:$0xf] %vm709_vm4, %v680_v60  ;;  %718 = vst.msk [vmem:[#allocation2 + $0x20] sm:$0xf] %vm709_vm4, %v678_v42 }
 0x122   : > { %v684_v21 = vpop.permute.xlu1 %683  ;;  %v682_v61 = vpop.permute.xlu0 %681 }
 0x123   : > { %721 = vst.msk [vmem:[#allocation2 + $0x2c] sm:$0xf] %vm709_vm4, %v684_v21  ;;  %720 = vst.msk [vmem:[#allocation2 + $0x28] sm:$0xf] %vm709_vm4, %v682_v61 }
 0x126   : > { %v811_v35 = vpop.permute.xlu1 %810  ;;  %v809_v62 = vpop.permute.xlu0 %808 }
 0x127   : > { %850 = vst.msk [vmem:[#allocation2 + $0x24] sm:$0xf] %vm840_vm5, %v811_v35  ;;  %849 = vst.msk [vmem:[#allocation2 + $0x20] sm:$0xf] %vm840_vm5, %v809_v62 }
 0x12a   : > { %v815_v0 = vpop.permute.xlu1 %814  ;;  %v813_v1 = vpop.permute.xlu0 %812 }
 0x12b   : > { %852 = vst.msk [vmem:[#allocation2 + $0x2c] sm:$0xf] %vm840_vm5, %v815_v0  ;;  %851 = vst.msk [vmem:[#allocation2 + $0x28] sm:$0xf] %vm840_vm5, %v813_v1 }
 0x12e   : > { %v942_v2 = vpop.permute.xlu1 %941  ;;  %v940_v3 = vpop.permute.xlu0 %939 }
 0x12f   : > { %981 = vst.msk [vmem:[#allocation2 + $0x24] sm:$0xf] %vm971_vm6, %v942_v2  ;;  %980 = vst.msk [vmem:[#allocation2 + $0x20] sm:$0xf] %vm971_vm6, %v940_v3 }
 0x132   : > { %v946_v4 = vpop.permute.xlu1 %945  ;;  %v944_v5 = vpop.permute.xlu0 %943 }
 0x133   : > { %983 = vst.msk [vmem:[#allocation2 + $0x2c] sm:$0xf] %vm971_vm6, %v946_v4  ;;  %982 = vst.msk [vmem:[#allocation2 + $0x28] sm:$0xf] %vm971_vm6, %v944_v5 }
 0x136   : > { %v1073_v6 = vpop.permute.xlu1 %1072  ;;  %v1071_v7 = vpop.permute.xlu0 %1070 }
 0x137   : > { %1112 = vst.msk [vmem:[#allocation2 + $0x24] sm:$0xf] %vm1102_vm7, %v1073_v6  ;;  %1111 = vst.msk [vmem:[#allocation2 + $0x20] sm:$0xf] %vm1102_vm7, %v1071_v7 }
 0x13a   : > { %v1077_v8 = vpop.permute.xlu1 %1076  ;;  %v1075_v9 = vpop.permute.xlu0 %1074 }
 0x13b   : > { %1114 = vst.msk [vmem:[#allocation2 + $0x2c] sm:$0xf] %vm1102_vm7, %v1077_v8  ;;  %1113 = vst.msk [vmem:[#allocation2 + $0x28] sm:$0xf] %vm1102_vm7, %v1075_v9 }
 0x13e   : > { %v1204_v10 = vpop.permute.xlu1 %1203  ;;  %v1202_v11 = vpop.permute.xlu0 %1201 }
 0x13f   : > { %1243 = vst.msk [vmem:[#allocation2 + $0x24] sm:$0xf] %vm1233_vm8, %v1204_v10  ;;  %1242 = vst.msk [vmem:[#allocation2 + $0x20] sm:$0xf] %vm1233_vm8, %v1202_v11 }
 0x142   : > { %v1208_v12 = vpop.permute.xlu1 %1207  ;;  %v1206_v13 = vpop.permute.xlu0 %1205 }
 0x143   : > { %1245 = vst.msk [vmem:[#allocation2 + $0x2c] sm:$0xf] %vm1233_vm8, %v1208_v12  ;;  %1244 = vst.msk [vmem:[#allocation2 + $0x28] sm:$0xf] %vm1233_vm8, %v1206_v13 }
 0x146   : > { %v1335_v14 = vpop.permute.xlu1 %1334  ;;  %v1333_v15 = vpop.permute.xlu0 %1332 }
 0x147   : > { %1374 = vst.msk [vmem:[#allocation2 + $0x24] sm:$0xf] %vm1364_vm9, %v1335_v14  ;;  %1373 = vst.msk [vmem:[#allocation2 + $0x20] sm:$0xf] %vm1364_vm9, %v1333_v15 }
 0x14a   : > { %v426_v16 = vpop.permute.xlu1 %425  ;;  %v424_v17 = vpop.permute.xlu0 %423 }
 0x14b   : > { %461 = vst.msk [vmem:[#allocation2 + $0x34] sm:$0xf] %vm447_vm2, %v426_v16  ;;  %460 = vst.msk [vmem:[#allocation2 + $0x30] sm:$0xf] %vm447_vm2, %v424_v17 }
 0x14e   : > { %v1339_v18 = vpop.permute.xlu1 %1338  ;;  %v1337_v19 = vpop.permute.xlu0 %1336  ;;  %v2607_v20 = vld [vmem:[#allocation2 + $0x20] sm:$0xff]  }
 0x14f   : > { %1376 = vst.msk [vmem:[#allocation2 + $0x2c] sm:$0xf] %vm1364_vm9, %v1339_v18  ;;  %1375 = vst.msk [vmem:[#allocation2 + $0x28] sm:$0xf] %vm1364_vm9, %v1337_v19  ;;  %2493 = vmatprep.mubr.msk.bf16.mxu0 %vm1464_vm10, %v2607_v20 }
 0x152   : > { %v430_v22 = vpop.permute.xlu1 %429  ;;  %v428_v23 = vpop.permute.xlu0 %427 }
 0x153   : > { %463 = vst.msk [vmem:[#allocation2 + $0x3c] sm:$0xf] %vm447_vm2, %v430_v22  ;;  %462 = vst.msk [vmem:[#allocation2 + $0x38] sm:$0xf] %vm447_vm2, %v428_v23  ;;  %v2611_v23 = vld [vmem:[%s3441_s3] sm:$0xff]  }
 0x154   : > { %2517 = vmatprep.mubr.msk.bf16.mxu1 %vm1739_vm11, %v2611_v23 }
 0x156   : > { %v557_v24 = vpop.permute.xlu1 %556  ;;  %v555_v43 = vpop.permute.xlu0 %554  ;;  %v2608_v26 = vld [vmem:[#allocation2 + $0x28] sm:$0xff]  }
 0x157   : > { %592 = vst.msk [vmem:[#allocation2 + $0x34] sm:$0xf] %vm578_vm3, %v557_v24  ;;  %591 = vst.msk [vmem:[#allocation2 + $0x30] sm:$0xf] %vm578_vm3, %v555_v43  ;;  %2494 = vmatmul.mubr.msk.bf16.gmra.mxu0 %vm1464_vm10, %v2608_v26  ;;  %v1714_v43 = vld [vmem:[%s3442_s4 + $0x8] sm:$0xff]  ;;  %v1713_v26 = vld [vmem:[%s3442_s4] sm:$0xff] }
 0x15a   : > { %v561_v63 = vpop.permute.xlu1 %560  ;;  %v559_v27 = vpop.permute.xlu0 %558 }
 0x15b   : > { %594 = vst.msk [vmem:[#allocation2 + $0x3c] sm:$0xf] %vm578_vm3, %v561_v63  ;;  %593 = vst.msk [vmem:[#allocation2 + $0x38] sm:$0xf] %vm578_vm3, %v559_v27  ;;  %v2753_v27 = vmov 0  }
 0x15c   : > { %2599 = vset.pattern.permute.xlu1 %v2753_v27  ;;  %2598 = vset.pattern.permute.xlu0 %v2753_v27 }
 0x15d   : > { %1723 = vperm.xlu1 %2599, %v1714_v43   ;;  %1718 = vperm.xlu0 %2598, %v1713_v26  }
 0x15e   : > { %v688_v25 = vpop.permute.xlu1 %687  ;;  %v686_v29 = vpop.permute.xlu0 %685 }
 0x15f   : > { %723 = vst.msk [vmem:[#allocation2 + $0x34] sm:$0xf] %vm709_vm4, %v688_v25  ;;  %722 = vst.msk [vmem:[#allocation2 + $0x30] sm:$0xf] %vm709_vm4, %v686_v29  ;;  %v1715_v25 = vld [vmem:[%s3442_s4 + $0x10] sm:$0xff] }
 0x161   : > { %1728 = vperm.xlu1 %2599, %v1715_v25  }
 0x162   : > { %v692_v30 = vpop.permute.xlu1 %691  ;;  %v690_v31 = vpop.permute.xlu0 %689 }
 0x163   : > { %725 = vst.msk [vmem:[#allocation2 + $0x3c] sm:$0xf] %vm709_vm4, %v692_v30  ;;  %724 = vst.msk [vmem:[#allocation2 + $0x38] sm:$0xf] %vm709_vm4, %v690_v31 }
 0x166   : > { %v819_v32 = vpop.permute.xlu1 %818  ;;  %v817_v28 = vpop.permute.xlu0 %816 }
 0x167   : > { %854 = vst.msk [vmem:[#allocation2 + $0x34] sm:$0xf] %vm840_vm5, %v819_v32  ;;  %853 = vst.msk [vmem:[#allocation2 + $0x30] sm:$0xf] %vm840_vm5, %v817_v28 }
 0x16a   : > { %v823_v33 = vpop.permute.xlu1 %822  ;;  %v821_v34 = vpop.permute.xlu0 %820 }
 0x16b   : > { %856 = vst.msk [vmem:[#allocation2 + $0x3c] sm:$0xf] %vm840_vm5, %v823_v33  ;;  %855 = vst.msk [vmem:[#allocation2 + $0x38] sm:$0xf] %vm840_vm5, %v821_v34 }
 0x16e   : > { %v950_v36 = vpop.permute.xlu1 %949  ;;  %v948_v37 = vpop.permute.xlu0 %947 }
 0x16f   : > { %985 = vst.msk [vmem:[#allocation2 + $0x34] sm:$0xf] %vm971_vm6, %v950_v36  ;;  %984 = vst.msk [vmem:[#allocation2 + $0x30] sm:$0xf] %vm971_vm6, %v948_v37 }
 0x172   : > { %v954_v38 = vpop.permute.xlu1 %953  ;;  %v952_v39 = vpop.permute.xlu0 %951 }
 0x173   : > { %987 = vst.msk [vmem:[#allocation2 + $0x3c] sm:$0xf] %vm971_vm6, %v954_v38  ;;  %986 = vst.msk [vmem:[#allocation2 + $0x38] sm:$0xf] %vm971_vm6, %v952_v39 }
 0x176   : > { %v1081_v40 = vpop.permute.xlu1 %1080  ;;  %v1079_v41 = vpop.permute.xlu0 %1078 }
 0x177   : > { %1116 = vst.msk [vmem:[#allocation2 + $0x34] sm:$0xf] %vm1102_vm7, %v1081_v40  ;;  %1115 = vst.msk [vmem:[#allocation2 + $0x30] sm:$0xf] %vm1102_vm7, %v1079_v41 }
 0x17a   : > { %v1085_v44 = vpop.permute.xlu1 %1084  ;;  %v1083_v45 = vpop.permute.xlu0 %1082 }
 0x17b   : > { %1118 = vst.msk [vmem:[#allocation2 + $0x3c] sm:$0xf] %vm1102_vm7, %v1085_v44  ;;  %1117 = vst.msk [vmem:[#allocation2 + $0x38] sm:$0xf] %vm1102_vm7, %v1083_v45 }
 0x17e   : > { %v1212_v46 = vpop.permute.xlu1 %1211  ;;  %v1210_v47 = vpop.permute.xlu0 %1209 }
 0x17f   : > { %1247 = vst.msk [vmem:[#allocation2 + $0x34] sm:$0xf] %vm1233_vm8, %v1212_v46  ;;  %1246 = vst.msk [vmem:[#allocation2 + $0x30] sm:$0xf] %vm1233_vm8, %v1210_v47 }
 0x182   : > { %v1216_v48 = vpop.permute.xlu1 %1215  ;;  %v1214_v49 = vpop.permute.xlu0 %1213 }
 0x183   : > { %1249 = vst.msk [vmem:[#allocation2 + $0x3c] sm:$0xf] %vm1233_vm8, %v1216_v48  ;;  %1248 = vst.msk [vmem:[#allocation2 + $0x38] sm:$0xf] %vm1233_vm8, %v1214_v49 }
 0x186   : > { %v1343_v50 = vpop.permute.xlu1 %1342  ;;  %v1341_v51 = vpop.permute.xlu0 %1340 }
 0x187   : > { %1378 = vst.msk [vmem:[#allocation2 + $0x34] sm:$0xf] %vm1364_vm9, %v1343_v50  ;;  %1377 = vst.msk [vmem:[#allocation2 + $0x30] sm:$0xf] %vm1364_vm9, %v1341_v51 }
 0x18a   : > { %v1347_v52 = vpop.permute.xlu1 %1346  ;;  %v1345_v53 = vpop.permute.xlu0 %1344 }
 0x18b   : > { %1380 = vst.msk [vmem:[#allocation2 + $0x3c] sm:$0xf] %vm1364_vm9, %v1347_v52  ;;  %1379 = vst.msk [vmem:[#allocation2 + $0x38] sm:$0xf] %vm1364_vm9, %v1345_v53 }
 0x18e   : > { %v2609_v54 = vld [vmem:[#allocation2 + $0x30] sm:$0xff]  }
 0x18f   : > { %2497 = vmatprep.mubr.msk.bf16.mxu0 %vm1464_vm10, %v2609_v54 }
 0x192   : > { %v2610_v55 = vld [vmem:[#allocation2 + $0x38] sm:$0xff]  }
 0x193   : > { %2498 = vmatmul.mubr.msk.bf16.gmra.mxu0 %vm1464_vm10, %v2610_v55 }
 0x197   : > { %v2487_v57 = vpop.f32.mrf.mxu0 }
 0x198   : > { %v1536_v58 = vadd.f32 %v2487_v57, %v3307_v56 }
 0x199   : > { %v1527_v59 = vpop.f32.mrf.mxu0 }
 0x19a   : > { %v2290_v60 = vmul.f32 -1.442695, %v1536_v58  ;;  %v1528_v42 = vadd.f32 %v3307_v56, %v1527_v59 }
 0x19b   : > { %v2488_v21 = vpop.f32.mrf.mxu0 }
 0x19c   : > { %2613 = vpow2.f32 %v2290_v60  ;;  %v2288_v61 = vmul.f32 -1.442695, %v1528_v42  ;;  %v1539_v35 = vadd.f32 %v2488_v21, %v3307_v56 }
 0x19d   : > { %v1530_v62 = vpop.f32.mrf.mxu0 }
 0x19e   : > { %2615 = vpow2.f32 %v2288_v61  ;;  %v2291_v0 = vmul.f32 -1.442695, %v1539_v35  ;;  %v1531_v1 = vadd.f32 %v3307_v56, %v1530_v62 }
 0x1a0   : > { %2617 = vpow2.f32 %v2291_v0  ;;  %v2289_v2 = vmul.f32 -1.442695, %v1531_v1 }
 0x1a2   : > { %2619 = vpow2.f32 %v2289_v2 }
 0x1a9   : > { %v2614_v3 = vpop.eup %2613 }
 0x1aa   : > { %v1640_v4 = vadd.f32 1.0, %v2614_v3 }
 0x1ab   : > { %v2616_v5 = vpop.eup %2615 }
 0x1ac   : > { %v1638_v6 = vadd.f32 1.0, %v2616_v5  ;;  %2621 = vrcp.f32 %v1640_v4 }
 0x1ad   : > { %v2618_v7 = vpop.eup %2617 }
 0x1ae   : > { %v1641_v8 = vadd.f32 1.0, %v2618_v7  ;;  %2623 = vrcp.f32 %v1638_v6 }
 0x1af   : > { %v2620_v9 = vpop.eup %2619 }
 0x1b0   : > { %2625 = vrcp.f32 %v1641_v8  ;;  %v1639_v10 = vadd.f32 1.0, %v2620_v9 }
 0x1b2   : > { %2627 = vrcp.f32 %v1639_v10 }
 0x1b9   : > { %v2622_v11 = vpop.eup %2621 }
 0x1ba   : > { %v1688_v14 = vmul.f32 %v2622_v11, %v1536_v58 }
 0x1bb   : > { %v2624_v12 = vpop.eup %2623 }
 0x1bc   : > { %v1686_v17 = vmul.f32 %v2624_v12, %v1528_v42 }
 0x1bd   : > { %v2626_v13 = vpop.eup %2625 }
 0x1be   : > { %v1689_v15 = vmul.f32 %v2626_v13, %v1539_v35 }
 0x1bf   : > { %v2628_v16 = vpop.eup %2627 }
 0x1c0   : > { %v3313_v18 = vpack.c.bf16 %v1689_v15, %v1688_v14  ;;  %v1687_v19 = vmul.f32 %v2628_v16, %v1531_v1 }
 0x1c2   : > { %v3315_v20 = vpack.c.bf16 %v1687_v19, %v1686_v17 }
 0x1d7   : > { %v2491_v22 = vpop.f32.mrf.mxu0 }
 0x1d8   : > { %v3362_v42 = vadd.f32 %v2491_v22, %v3307_v56 }
 0x1d9   : > { %v3321_v24 = vpop.f32.mrf.mxu0 }
 0x1da   : > { %v2294_v2 = vmul.f32 -1.442695, %v3362_v42  ;;  %v3371_v7 = vadd.f32 %v3307_v56, %v3321_v24 }
 0x1db   : > { %v2492_v63 = vpop.f32.mrf.mxu0 }
 0x1dc   : > { %v3359_v58 = vadd.f32 %v2492_v63, %v3307_v56  ;;  %v2292_v11 = vmul.f32 -1.442695, %v3371_v7 }
 0x1dd   : > { %v1546_v29 = vpop.f32.mrf.mxu0 }
 0x1de   : > { %v2295_v35 = vmul.f32 -1.442695, %v3359_v58  ;;  %v3367_v5 = vadd.f32 %v3307_v56, %v1546_v29 }
 0x1e0   : > { %v2293_v9 = vmul.f32 -1.442695, %v3367_v5 }
 0x217   : > { %v2495_v30 = vpop.f32.mrf.mxu0 }
 0x218   : > { %v3343_v41 = vadd.f32 %v2495_v30, %v3307_v56 }
 0x219   : > { %v1559_v31 = vpop.f32.mrf.mxu0 }
 0x21a   : > { %v2298_v50 = vmul.f32 -1.442695, %v3343_v41  ;;  %v3354_v53 = vadd.f32 %v3307_v56, %v1559_v31 }
 0x21b   : > { %v2496_v32 = vpop.f32.mrf.mxu0 }
 0x21c   : > { %v3336_v36 = vadd.f32 %v2496_v32, %v3307_v56  ;;  %v2296_v55 = vmul.f32 -1.442695, %v3354_v53 }
 0x21d   : > { %v1562_v28 = vpop.f32.mrf.mxu0 }
 0x21e   : > { %v2299_v46 = vmul.f32 -1.442695, %v3336_v36  ;;  %v3351_v52 = vadd.f32 %v3307_v56, %v1562_v28 }
 0x220   : > { %v2297_v54 = vmul.f32 -1.442695, %v3351_v52 }
 0x253   : > { %v2499_v33 = vpop.f32.mrf.mxu0 }
 0x254   : > { %v3333_v34 = vadd.f32 %v2499_v33, %v3307_v56 }
 0x255   : > { %v1575_v37 = vpop.f32.mrf.mxu0 }
 0x256   : > { %v2302_v38 = vmul.f32 -1.442695, %v3333_v34  ;;  %v3340_v39 = vadd.f32 %v3307_v56, %v1575_v37 }
 0x257   : > { %v2500_v40 = vpop.f32.mrf.mxu0 }
 0x258   : > { %2629 = vpow2.f32 %v2302_v38  ;;  %v2300_v44 = vmul.f32 -1.442695, %v3340_v39  ;;  %v1587_v45 = vadd.f32 %v2500_v40, %v3307_v56 }
 0x259   : > { %v1578_v47 = vpop.f32.mrf.mxu0 }
 0x25a   : > { %2631 = vpow2.f32 %v2300_v44  ;;  %v2303_v48 = vmul.f32 -1.442695, %v1587_v45  ;;  %v1579_v49 = vadd.f32 %v3307_v56, %v1578_v47 }
 0x25c   : > { %2633 = vpow2.f32 %v2303_v48  ;;  %v2301_v51 = vmul.f32 -1.442695, %v1579_v49 }
 0x25d   : > { %2635 = vpow2.f32 %v2299_v46 }
 0x25e   : > { %2637 = vpow2.f32 %v2301_v51 }
 0x25f   : > { %2639 = vpow2.f32 %v2298_v50 }
 0x260   : > { %2641 = vpow2.f32 %v2297_v54 }
 0x261   : > { %2643 = vpow2.f32 %v2296_v55 }
 0x265   : > { %v2630_v57 = vpop.eup %2629 }
 0x266   : > { %v1652_v59 = vadd.f32 1.0, %v2630_v57 }
 0x267   : > { %v2632_v60 = vpop.eup %2631 }
 0x268   : > { %v1650_v21 = vadd.f32 1.0, %v2632_v60  ;;  %2645 = vrcp.f32 %v1652_v59 }
 0x269   : > { %v2634_v61 = vpop.eup %2633 }
 0x26a   : > { %v2636_v62 = vpop.eup %2635  ;;  %v1653_v0 = vadd.f32 1.0, %v2634_v61  ;;  %2647 = vrcp.f32 %v1650_v21 }
 0x26b   : > { %v2638_v1 = vpop.eup %2637  ;;  %v1649_v6 = vadd.f32 1.0, %v2636_v62  ;;  %v2612_v62 = vld [vmem:[%s3441_s3 + $0x8] ss:$0 sps:$4 sm:$0xff]  }
 0x26c   : > { %2649 = vrcp.f32 %v1653_v0  ;;  %v1651_v3 = vadd.f32 1.0, %v2638_v1  ;;  %v2640_v4 = vpop.eup %2639  ;;  %v1724_v0 = vpop.permute.xlu1 %1723 }
 0x26d   : > { %2651 = vpow2.f32 %v2295_v35  ;;  %v1648_v8 = vadd.f32 1.0, %v2640_v4  ;;  %v2642_v10 = vpop.eup %2641  ;;  %v1747_v35 = vsel %vm1739_vm11, %v3315_v20, 0 }
 0x26e   : > { %2653 = vrcp.f32 %v1651_v3  ;;  %v2644_v12 = vpop.eup %2643  ;;  %v1647_v13 = vadd.f32 1.0, %v2642_v10  ;;  %v1719_v3 = vpop.permute.xlu0 %1718 }
 0x26f   : > { %2655 = vpow2.f32 %v2294_v2  ;;  %v1646_v16 = vadd.f32 1.0, %v2644_v12 }
 0x270   : > { %2657 = vrcp.f32 %v1649_v6  ;;  %v1729_v1 = vpop.permute.xlu1 %1728 }
 0x271   : > { %2659 = vrcp.f32 %v1648_v8 }
 0x272   : > { %2661 = vpow2.f32 %v2293_v9 }
 0x273   : > { %2663 = vpow2.f32 %v2292_v11 }
 0x274   : > { %2665 = vrcp.f32 %v1647_v13 }
 0x275   : > { %v2646_v14 = vpop.eup %2645  ;;  %2667 = vrcp.f32 %v1646_v16 }
 0x276   : > { %v1700_v56 = vmul.f32 %v2646_v14, %v3333_v34 }
 0x277   : > { %v2648_v15 = vpop.eup %2647 }
 0x278   : > { %v1698_v24 = vmul.f32 %v2648_v15, %v3340_v39 }
 0x279   : > { %v2650_v17 = vpop.eup %2649 }
 0x27a   : > { %v2652_v19 = vpop.eup %2651  ;;  %v1701_v22 = vmul.f32 %v2650_v17, %v1587_v45 }
 0x27b   : > { %v2654_v23 = vpop.eup %2653  ;;  %v1645_v27 = vadd.f32 1.0, %v2652_v19 }
 0x27c   : > { %v1699_v43 = vmul.f32 %v2654_v23, %v1579_v49  ;;  %v1709_v26 = vpack.c.bf16 %v1701_v22, %v1700_v56  ;;  %v2656_v63 = vpop.eup %2655 }
 0x27d   : > { %v2658_v30 = vpop.eup %2657  ;;  %v1644_v31 = vadd.f32 1.0, %v2656_v63  ;;  %2669 = vrcp.f32 %v1645_v27 }
 0x27e   : > { %v1708_v25 = vpack.c.bf16 %v1699_v43, %v1698_v24  ;;  %2522 = vmatprep.subr.msk.bf16.mxu1 %vm1739_vm11, %v1709_v26  ;;  %v1768_v29 = vsel %vm1739_vm11, %v1709_v26, 0  ;;  %v2660_v32 = vpop.eup %2659  ;;  %v1697_v28 = vmul.f32 %v2658_v30, %v3336_v36 }
 0x27f   : > { %2502 = vmatpush3.bf16.xpose.msra.mxu1 %v1768_v29  ;;  %v2662_v33 = vpop.eup %2661  ;;  %2671 = vrcp.f32 %v1644_v31  ;;  %v1696_v34 = vmul.f32 %v2660_v32, %v3343_v41 }
 0x280   : > { %2523 = vmatprep.subr.msk.bf16.mxu1 %vm1739_vm11, %v1708_v25  ;;  %v2664_v37 = vpop.eup %2663  ;;  %v1643_v38 = vadd.f32 1.0, %v2662_v33  ;;  %v1765_v40 = vsel %vm1739_vm11, %v1708_v25, 0 }
 0x281   : > { %v1707_v39 = vpack.c.bf16 %v1697_v28, %v1696_v34  ;;  %v2666_v44 = vpop.eup %2665  ;;  %v1642_v45 = vadd.f32 1.0, %v2664_v37 }
 0x282   : > { %v2668_v46 = vpop.eup %2667  ;;  %2673 = vrcp.f32 %v1643_v38  ;;  %v1695_v47 = vmul.f32 %v2666_v44, %v3351_v52 }
 0x283   : > { %2675 = vrcp.f32 %v1642_v45  ;;  %v1694_v36 = vmul.f32 %v2668_v46, %v3354_v53  ;;  %v1762_v41 = vsel %vm1739_vm11, %v1707_v39, 0 }
 0x285   : > { %v1706_v48 = vpack.c.bf16 %v1695_v47, %v1694_v36 }
 0x287   : > { %2504 = vmatpush3.bf16.xpose.msra.mxu1 %v1765_v40  ;;  %v1759_v57 = vsel %vm1739_vm11, %v1706_v48, 0 }
 0x288   : > { %2524 = vmatprep.subr.msk.bf16.mxu1 %vm1739_vm11, %v1707_v39 }
 0x28a   : > { %v2670_v49 = vpop.eup %2669 }
 0x28b   : > { %v1693_v51 = vmul.f32 %v2670_v49, %v3359_v58 }
 0x28c   : > { %v2672_v50 = vpop.eup %2671 }
 0x28d   : > { %v1692_v54 = vmul.f32 %v2672_v50, %v3362_v42  ;;  %v1750_v42 = vsel %vm1739_vm11, %v3313_v18, 0 }
 0x28f   : > { %2506 = vmatpush3.bf16.xpose.msra.mxu1 %v1762_v41  ;;  %v1705_v55 = vpack.c.bf16 %v1693_v51, %v1692_v54  ;;  %v2674_v59 = vpop.eup %2673 }
 0x290   : > { %2525 = vmatprep.subr.msk.bf16.mxu1 %vm1739_vm11, %v1706_v48  ;;  %v2676_v52 = vpop.eup %2675  ;;  %v1691_v53 = vmul.f32 %v2674_v59, %v3367_v5 }
 0x291   : > { %v1690_v60 = vmul.f32 %v2676_v52, %v3371_v7  ;;  %v1756_v61 = vsel %vm1739_vm11, %v1705_v55, 0 }
 0x293   : > { %v1704_v21 = vpack.c.bf16 %v1691_v53, %v1690_v60 }
 0x295   : > { %v1753_v58 = vsel %vm1739_vm11, %v1704_v21, 0 }
 0x297   : > { %2508 = vmatpush3.bf16.xpose.msra.mxu1 %v1759_v57 }
 0x298   : > { %2526 = vmatprep.subr.msk.bf16.mxu1 %vm1739_vm11, %v1705_v55 }
 0x29f   : > { %2510 = vmatpush3.bf16.xpose.msra.mxu1 %v1756_v61 }
 0x2a0   : > { %2527 = vmatprep.subr.msk.bf16.mxu1 %vm1739_vm11, %v1704_v21 }
 0x2a7   : > { %2512 = vmatpush3.bf16.xpose.msra.mxu1 %v1753_v58 }
 0x2a8   : > { %2528 = vmatprep.subr.msk.bf16.mxu1 %vm1739_vm11, %v3313_v18 }
 0x2af   : > { %2514 = vmatpush3.bf16.xpose.msra.mxu1 %v1750_v42 }
 0x2b0   : > { %2529 = vmatprep.subr.msk.bf16.mxu1 %vm1739_vm11, %v3315_v20 }
 0x2b7   : > { %2516 = vmatpush3.bf16.xpose.msra.mxu1 %v1747_v35 }
 0x2be   : > { %2518 = vmatmul.mubr.msk.bf16.vlgmr.msra.gmra.mxu1 %vm1739_vm11, %v2612_v62 }
 0x37e   : > { %v2519_v2 = vpop.f32.mrf.mxu1 }
 0x37f   : > { %v1813_v4 = vadd.f32 %v2519_v2, %v1729_v1 }
 0x380   : > { %v1804_v18 = vpop.f32.mrf.mxu1 }
 0x381   : > { %v2310_v5 = vmul.f32 -1.442695, %v1813_v4  ;;  %v1805_v6 = vadd.f32 %v1804_v18, %v1719_v3 }
 0x382   : > { %v2520_v7 = vpop.f32.mrf.mxu1 }
 0x383   : > { %2677 = vpow2.f32 %v2310_v5  ;;  %v2308_v8 = vmul.f32 -1.442695, %v1805_v6 }
 0x384   : > { %v1807_v20 = vpop.f32.mrf.mxu1 }
 0x385   : > { %2679 = vpow2.f32 %v2308_v8  ;;  %v1808_v9 = vadd.f32 %v1807_v20, %v1724_v0 }
 0x387   : > { %v2309_v10 = vmul.f32 -1.442695, %v1808_v9 }
 0x389   : > { %2681 = vpow2.f32 %v2309_v10 }
 0x390   : > { %v2678_v11 = vpop.eup %2677 }
 0x391   : > { %v1829_v12 = vadd.f32 1.0, %v2678_v11 }
 0x392   : > { %v2680_v13 = vpop.eup %2679 }
 0x393   : > { %2683 = vrcp.f32 %v1829_v12  ;;  %v1827_v14 = vadd.f32 1.0, %v2680_v13 }
 0x395   : > { %2685 = vrcp.f32 %v1827_v14 }
 0x396   : > { %v2682_v15 = vpop.eup %2681 }
 0x397   : > { %v1828_v16 = vadd.f32 1.0, %v2682_v15 }
 0x399   : > { %2687 = vrcp.f32 %v1828_v16 }
 0x3a0   : > { %v2684_v17 = vpop.eup %2683 }
 0x3a1   : > { %1838 = vst [vmem:[%s227_s15 + $0x10] sm:$0xff] %v2684_v17 }
 0x3a2   : > { %v2686_v19 = vpop.eup %2685 }
 0x3a3   : > { %1836 = vst [vmem:[%s227_s15] sm:$0xff] %v2686_v19  ;;  %1845 = sbr.rel (!%p2830_p5) target bundleno = 944 (0x3b0), region = 44 }
 0x3a6   : > { %v2688_v56 = vpop.eup %2687 }
 0x3a7   : > { %1837 = vst [vmem:[%s227_s15 + $0x8] sm:$0xff] %v2688_v56 }
 0x3a8   : > { %v1886_v24 = vld [vmem:[%s227_s15 + $0x10] sm:$0xff] }
 0x3a9   : > { %1887 = vst [vmem:[%s1849_s30 + $0x30] sm:$0xff] %v1886_v24 }
 0x3aa   : > { %v1882_v22 = vld [vmem:[%s227_s15] sm:$0xff] }
 0x3ab   : > { %1883 = vst [vmem:[%s1849_s30] sm:$0xff] %v1882_v22 }
 0x3ae   : > { %v1884_v23 = vld [vmem:[%s227_s15 + $0x8] sm:$0xff] }
 0x3af   : > { %1885 = vst [vmem:[%s1849_s30 + $0x18] sm:$0xff] %v1884_v23 }
 0x3b0 PF: > { %s15_s24 = sadd.s32 1, %s2743_s24   ;;  %s3445_s18 = smov %s2723_s19 }
 0x3b1   : > { %p12_p10 = scmp.ge.s32.totalorder %s15_s24, 8   ;;  %s3446_s19 = smov %s2841_s8 }
 0x3b2   : > { %s3447_s20 = smov %s2735_s22  ;;  %s3448_s21 = smov %s2739_s23 }
 0x3b3   : > { %s3449_s22 = smov %s3452_s25  ;;  %s3450_s23 = smov %s3456_s26 }
 0x3b4   :  { %14 = sbr.rel (!%p12_p10) target bundleno = 4 (0x4), region = 117 }

</bundles_post_ra>
